<compile_context>
chip_gen: v7x
topology: tpu7x:2x2x1
jax: 0.10.0
libtpu: 0.0.40
codegen_flags: <defaults>
</compile_context>

<pallas_src>
import jax
import jax.numpy as jnp
from jax.experimental import pallas as pl
from jax.experimental.pallas import tpu as pltpu

NUM_HEADS = 4                     # cfg.encoder_attention_heads
LN_EPS = 1e-5
VMEM_LIMIT = 32 * 1024 * 1024     # safe on v5e / v6e / v7x


def _pick_tile(dim, preferred, align):
    """`preferred` if it divides `dim` and is aligned, else the full dim
    (the toy shapes below always hit the full-dim branch)."""
    if dim % preferred == 0 and preferred % align == 0:
        return preferred
    return dim


def _compiler_params(semantics):
    return pltpu.CompilerParams(dimension_semantics=semantics,
                                vmem_limit_bytes=VMEM_LIMIT)


# --------------------------------------------------- fused LayerNorm + matmul
def _ln_matmul_kernel(x_ref, g_ref, b_ref, w_ref, wb_ref, o_ref):
    # LN recomputed per output tile; cheap VPU/XLU work hidden under the MXU matmul.
    x = x_ref[...].astype(jnp.float32)
    mu = jnp.mean(x, axis=-1, keepdims=True)
    var = jnp.mean(jnp.square(x - mu), axis=-1, keepdims=True)
    xn = (x - mu) * jax.lax.rsqrt(var + LN_EPS) * g_ref[...] + b_ref[...]
    acc = jnp.dot(xn.astype(w_ref.dtype), w_ref[...],
                  preferred_element_type=jnp.float32) + wb_ref[...]
    o_ref[...] = acc.astype(o_ref.dtype)


def pallas_ln_matmul(x, g, b, w, wb, *, tm_pref=256, tn_pref=512):
    """out = LayerNorm(x; g, b) @ w + wb, tiled over (token tiles, out-col tiles)."""
    M, K = x.shape
    N = w.shape[1]
    tm = _pick_tile(M, tm_pref, 8)
    tn = _pick_tile(N, tn_pref, 128)
    return pl.pallas_call(
        _ln_matmul_kernel,
        out_shape=jax.ShapeDtypeStruct((M, N), x.dtype),
        grid=(M // tm, N // tn),
        in_specs=[
            pl.BlockSpec((tm, K), lambda i, j: (i, 0)),
            pl.BlockSpec((1, K), lambda i, j: (0, 0)),
            pl.BlockSpec((1, K), lambda i, j: (0, 0)),
            pl.BlockSpec((K, tn), lambda i, j: (0, j)),
            pl.BlockSpec((1, tn), lambda i, j: (0, j)),
        ],
        out_specs=pl.BlockSpec((tm, tn), lambda i, j: (i, j)),
        compiler_params=_compiler_params(("parallel", "parallel")),
    )(x, g.reshape(1, K), b.reshape(1, K), w, wb.reshape(1, N))


# ------------------------------------------------------------- attention kernel
def _attn_kernel(q_ref, k_ref, v_ref, o_ref):
    # q already carries the 1/sqrt(head_dim) scaling (folded into wq/bq).
    q = q_ref[...]            # (H, T, hd)
    k = k_ref[...]
    v = v_ref[...]
    s = jax.lax.dot_general(q, k, (((2,), (2,)), ((0,), (0,))),
                            preferred_element_type=jnp.float32)       # (H, T, T)
    s = s - jnp.max(s, axis=-1, keepdims=True)
    p = jnp.exp(s)
    p = p * pl.reciprocal(jnp.sum(p, axis=-1, keepdims=True), approx=True)
    o = jax.lax.dot_general(p.astype(v.dtype), v, (((2,), (1,)), ((0,), (0,))),
                            preferred_element_type=jnp.float32)       # (H, T, hd)
    o_ref[...] = o.astype(o_ref.dtype)
    # TODO(synk): no attn_mask / key_padding_mask (the reference forward receives
    # None here); for long T convert to an online-softmax (flash) loop over KV tiles.


def pallas_attention(q, k, v, heads_per_step):
    BH, T, D = q.shape
    spec = pl.BlockSpec((heads_per_step, T, D), lambda b: (b, 0, 0))
    return pl.pallas_call(
        _attn_kernel,
        out_shape=jax.ShapeDtypeStruct((BH, T, D), q.dtype),
        grid=(BH // heads_per_step,),
        in_specs=[spec, spec, spec],
        out_specs=spec,
        compiler_params=_compiler_params(("parallel",)),
    )(q, k, v)


# ------------------------------- attention out-proj + residual + final LayerNorm
def _outproj_res_ln_kernel(ctx_ref, res_ref, w_ref, b_ref, g_ref, gb_ref,
                           x1_ref, xn_ref, acc_ref):
    k = pl.program_id(1)

    @pl.when(k == 0)
    def _():
        acc_ref[...] = jnp.zeros_like(acc_ref)

    acc_ref[...] += jnp.dot(ctx_ref[...], w_ref[...],
                            preferred_element_type=jnp.float32)

    @pl.when(k == pl.num_programs(1) - 1)
    def _():
        x1 = acc_ref[...] + b_ref[...] + res_ref[...].astype(jnp.float32)
        x1_ref[...] = x1.astype(x1_ref.dtype)
        mu = jnp.mean(x1, axis=-1, keepdims=True)
        var = jnp.mean(jnp.square(x1 - mu), axis=-1, keepdims=True)
        xn = (x1 - mu) * jax.lax.rsqrt(var + LN_EPS) * g_ref[...] + gb_ref[...]
        xn_ref[...] = xn.astype(xn_ref.dtype)


def pallas_outproj_residual_ln(ctx, res, w, b, g, gb, *, tm_pref=256, tk_pref=512):
    """x1 = res + ctx @ w + b ;  xn = LayerNorm(x1; g, gb).  K tiled, fp32 acc."""
    M, K = ctx.shape
    C = w.shape[1]
    tm = _pick_tile(M, tm_pref, 8)
    tk = _pick_tile(K, tk_pref, 128)
    out_spec = pl.BlockSpec((tm, C), lambda i, k: (i, 0))
    return pl.pallas_call(
        _outproj_res_ln_kernel,
        out_shape=(jax.ShapeDtypeStruct((M, C), ctx.dtype),
                   jax.ShapeDtypeStruct((M, C), ctx.dtype)),
        grid=(M // tm, K // tk),
        in_specs=[
            pl.BlockSpec((tm, tk), lambda i, k: (i, k)),
            pl.BlockSpec((tm, C), lambda i, k: (i, 0)),
            pl.BlockSpec((tk, C), lambda i, k: (k, 0)),
            pl.BlockSpec((1, C), lambda i, k: (0, 0)),
            pl.BlockSpec((1, C), lambda i, k: (0, 0)),
            pl.BlockSpec((1, C), lambda i, k: (0, 0)),
        ],
        out_specs=(out_spec, out_spec),
        scratch_shapes=[pltpu.VMEM((tm, C), jnp.float32)],
        compiler_params=_compiler_params(("parallel", "arbitrary")),
    )(ctx, res, w, b.reshape(1, C), g.reshape(1, C), gb.reshape(1, C))


# ------------------------------------- MoE: in-kernel top-1 gate + expert FFNs
def _moe_kernel(x_ref, res_ref, wg_ref, w1_ref, b1_ref, w2_ref, b2_ref,
                o_ref, acc_ref, gval_ref, gsel_ref):
    e = pl.program_id(1)
    num_experts = wg_ref.shape[-1]

    @pl.when(e == 0)
    def _():
        acc_ref[...] = jnp.zeros_like(acc_ref)
        # Top-1 gate, computed once per token tile (fp32 as in Top1Gate use_fp32).
        logits = jnp.dot(x_ref[...].astype(jnp.float32), wg_ref[...],
                         preferred_element_type=jnp.float32)          # (tm, E)
        gates = jax.nn.softmax(logits, axis=-1)
        gmax = jnp.max(gates, axis=-1, keepdims=True)
        col = jax.lax.broadcasted_iota(jnp.int32, gates.shape, 1)
        sel = jnp.min(jnp.where(gates >= gmax, col, num_experts),
                      axis=-1, keepdims=True)                          # first argmax
        gval_ref[...] = gmax
        gsel_ref[...] = sel.astype(jnp.int32)

    # This expert's combine weight per token: gate prob if the token routed here,
    # else 0.  (Dense/masked top-1 routing — see TODO at top of file.)
    cw = jnp.where(gsel_ref[...] == e, gval_ref[...], 0.0)             # (tm, 1)

    h = jnp.dot(x_ref[...], w1_ref[0], preferred_element_type=jnp.float32) + b1_ref[0]
    h = jnp.maximum(h, 0.0)                                            # relu
    y = jnp.dot(h.astype(x_ref.dtype), w2_ref[0],
                preferred_element_type=jnp.float32) + b2_ref[0]
    acc_ref[...] += cw * y                                             # fp32 accumulate

    @pl.when(e == pl.num_programs(1) - 1)
    def _():
        o_ref[...] = (res_ref[...].astype(jnp.float32) + acc_ref[...]).astype(o_ref.dtype)


def pallas_moe(xn, res, wg, w1, b1, w2, b2, *, tm_pref=256):
    """out = res + sum_e top1_gate_e(xn) * FFN_e(xn), tiled over token tiles."""
    N, C = xn.shape
    E, _, F = w1.shape
    tm = _pick_tile(N, tm_pref, 8)
    return pl.pallas_call(
        _moe_kernel,
        out_shape=jax.ShapeDtypeStruct((N, C), xn.dtype),
        grid=(N // tm, E),
        in_specs=[
            pl.BlockSpec((tm, C), lambda i, e: (i, 0)),
            pl.BlockSpec((tm, C), lambda i, e: (i, 0)),
            pl.BlockSpec((C, E), lambda i, e: (0, 0)),
            pl.BlockSpec((1, C, F), lambda i, e: (e, 0, 0)),
            pl.BlockSpec((1, 1, F), lambda i, e: (e, 0, 0)),
            pl.BlockSpec((1, F, C), lambda i, e: (e, 0, 0)),
            pl.BlockSpec((1, 1, C), lambda i, e: (e, 0, 0)),
        ],
        out_specs=pl.BlockSpec((tm, C), lambda i, e: (i, 0)),
        scratch_shapes=[
            pltpu.VMEM((tm, C), jnp.float32),   # fp32 expert accumulator
            pltpu.VMEM((tm, 1), jnp.float32),   # top-1 gate prob per token
            pltpu.VMEM((tm, 1), jnp.int32),     # top-1 expert id per token
        ],
        compiler_params=_compiler_params(("parallel", "arbitrary")),
    )(xn, res, wg, w1, b1, w2, b2)


# -------------------------------------------------------------- full forward
def unilm_moe_layer_forward(x, params):
    T, B, C = x.shape
    H = NUM_HEADS
    hd = C // H
    scaling = hd ** -0.5
    M = T * B

    # Fused QKV weights; head-dim scaling folded into the Q columns (and bias).
    wqkv = jnp.concatenate([params["wq"] * scaling, params["wk"], params["wv"]], axis=1)
    bqkv = jnp.concatenate([params["bq"] * scaling, params["bk"], params["bv"]], axis=0)

    # ----- self-attention block (pre-LN); LN fused into the QKV matmul -----
    xf = x.reshape(M, C)
    qkv = pallas_ln_matmul(xf, params["attn_ln_g"], params["attn_ln_b"], wqkv, bqkv)

    def to_heads(t):  # (M, C) -> (B*H, T, hd)
        return jnp.transpose(t.reshape(T, B, H, hd), (1, 2, 0, 3)).reshape(B * H, T, hd)

    q, k, v = qkv[:, :C], qkv[:, C:2 * C], qkv[:, 2 * C:]
    ctx = pallas_attention(to_heads(q), to_heads(k), to_heads(v), heads_per_step=H)
    ctx = jnp.transpose(ctx.reshape(B, H, T, hd), (2, 0, 1, 3)).reshape(M, C)

    # out-proj + dropout(identity) + residual + final LayerNorm, fused.
    x1, xn = pallas_outproj_residual_ln(
        ctx, xf, params["wo"], params["bo"],
        params["final_ln_g"], params["final_ln_b"])

    # ----- MoE block: gate + experts + residual, fused.  Tokens stay in
    # (T*B, C) order: gating and per-token FFNs are order-invariant, so the two
    # (T,B)<->(B,T) transposes of the reference are pure relabeling (dropped).
    y = pallas_moe(xn, x1, params["wg"],
                   params["w1"], params["b1"], params["w2"], params["b2"])
    x_out = y.reshape(T, B, C)

    # l_aux (scalar load-balance loss) — tiny (M, E) math, kept in plain JAX.
    E = params["wg"].shape[1]
    gates = jax.nn.softmax(jnp.dot(xn.astype(jnp.float32), params["wg"]), axis=-1)
    mask1 = jax.nn.one_hot(jnp.argmax(gates, axis=-1), E, dtype=jnp.float32)
    l_aux = jnp.mean(jnp.mean(gates, axis=0) * jnp.mean(mask1, axis=0)) * E * E

    attn_weights = None  # need_weights=False in the reference forward
    return x_out, attn_weights, l_aux


# -------------------------------------------------------------- params / main
def init_params(key, C, F, E):
    keys = jax.random.split(key, 8)
    s = 0.02

    def nrm(k, shape):
        return jax.random.normal(k, shape, jnp.float32) * s

    return dict(
        attn_ln_g=jnp.ones((C,), jnp.float32),
        attn_ln_b=jnp.zeros((C,), jnp.float32),
        final_ln_g=jnp.ones((C,), jnp.float32),
        final_ln_b=jnp.zeros((C,), jnp.float32),
        wq=nrm(keys[0], (C, C)), bq=jnp.zeros((C,), jnp.float32),
        wk=nrm(keys[1], (C, C)), bk=jnp.zeros((C,), jnp.float32),
        wv=nrm(keys[2], (C, C)), bv=jnp.zeros((C,), jnp.float32),
        wo=nrm(keys[3], (C, C)), bo=jnp.zeros((C,), jnp.float32),
        wg=nrm(keys[4], (C, E)),
        w1=nrm(keys[5], (E, C, F)), b1=jnp.zeros((E, 1, F), jnp.float32),
        w2=nrm(keys[6], (E, F, C)), b2=jnp.zeros((E, 1, C), jnp.float32),
    )


if __name__ == "__main__":
    T, B, C, F, E = 8, 2, 32, 64, 4   # seq, batch, embed, ffn_dim, num_experts
    key = jax.random.PRNGKey(0)
    kx, kp = jax.random.split(key)
    x = jax.random.normal(kx, (T, B, C), jnp.float32)
    params = init_params(kp, C, F, E)

    fwd = jax.jit(unilm_moe_layer_forward)
    out, attn, l_aux = fwd(x, params)
    jax.block_until_ready(out)
    jax.block_until_ready(l_aux)
    assert out.shape == (T, B, C)
    print("KERNEL_OK")
</pallas_src>

<mosaic_0001>
module attributes {stable_mosaic.version = 11 : i64} {
  func.func @_attn_kernel(%arg0: i32, %arg1: memref<4x8x8xf32, #tpu.memory_space<vmem>>, %arg2: memref<4x8x8xf32, #tpu.memory_space<vmem>>, %arg3: memref<4x8x8xf32, #tpu.memory_space<vmem>>, %arg4: memref<4x8x8xf32, #tpu.memory_space<vmem>>) attributes {dimension_semantics = [#tpu.dimension_semantics<parallel>], iteration_bounds = array<i64: 2>, scalar_prefetch = 0 : i64, scratch_operands = 0 : i64, tpu.core_type = #tpu.core_type<tc>, window_params = [{transform_indices = @transform_0, window_bounds = array<i64: 4, 8, 8>}, {transform_indices = @transform_1, window_bounds = array<i64: 4, 8, 8>}, {transform_indices = @transform_2, window_bounds = array<i64: 4, 8, 8>}, {transform_indices = @transform_3, window_bounds = array<i64: 4, 8, 8>}]} {
    %c0 = arith.constant 0 : index
    %c0_0 = arith.constant 0 : index
    %c0_1 = arith.constant 0 : index
    %0 = vector.load %arg1[%c0, %c0_0, %c0_1] : memref<4x8x8xf32, #tpu.memory_space<vmem>>, vector<4x8x8xf32>
    %c0_2 = arith.constant 0 : index
    %c0_3 = arith.constant 0 : index
    %c0_4 = arith.constant 0 : index
    %1 = vector.load %arg2[%c0_2, %c0_3, %c0_4] : memref<4x8x8xf32, #tpu.memory_space<vmem>>, vector<4x8x8xf32>
    %c0_5 = arith.constant 0 : index
    %c0_6 = arith.constant 0 : index
    %c0_7 = arith.constant 0 : index
    %2 = vector.load %arg3[%c0_5, %c0_6, %c0_7] : memref<4x8x8xf32, #tpu.memory_space<vmem>>, vector<4x8x8xf32>
    %cst = arith.constant dense<0.000000e+00> : vector<4x8x8xf32>
    %3 = tpu.matmul %0, %1, %cst {dimension_numbers = #tpu.dot_dimension_numbers<[2], [2], [1], [1], [0, 0, 0, 1, 1, 1], [0], [0]>} : vector<4x8x8xf32>, vector<4x8x8xf32>, vector<4x8x8xf32> -> vector<4x8x8xf32>
    %cst_8 = arith.constant dense<0xFF800000> : vector<4x8xf32>
    %4 = vector.multi_reduction <maximumf>, %3, %cst_8 [2] : vector<4x8x8xf32> to vector<4x8xf32>
    %5 = vector.shape_cast %4 : vector<4x8xf32> to vector<4x8x1xf32>
    %6 = vector.broadcast %5 : vector<4x8x1xf32> to vector<4x8x8xf32>
    %7 = arith.subf %3, %6 : vector<4x8x8xf32>
    %8 = math.exp %7 : vector<4x8x8xf32>
    %cst_9 = arith.constant dense<0.000000e+00> : vector<4x8xf32>
    %9 = vector.multi_reduction <add>, %8, %cst_9 [2] : vector<4x8x8xf32> to vector<4x8xf32>
    %10 = vector.shape_cast %9 : vector<4x8xf32> to vector<4x8x1xf32>
    %11 = tpu.reciprocal %10 {approx = true} : vector<4x8x1xf32> -> vector<4x8x1xf32>
    %12 = vector.broadcast %11 : vector<4x8x1xf32> to vector<4x8x8xf32>
    %13 = arith.mulf %8, %12 : vector<4x8x8xf32>
    %cst_10 = arith.constant dense<0.000000e+00> : vector<4x8x8xf32>
    %14 = tpu.matmul %13, %2, %cst_10 {dimension_numbers = #tpu.dot_dimension_numbers<[2], [1], [1], [2], [0, 0, 0, 1, 1, 2], [0], [0]>} : vector<4x8x8xf32>, vector<4x8x8xf32>, vector<4x8x8xf32> -> vector<4x8x8xf32>
    %c0_11 = arith.constant 0 : index
    %c0_12 = arith.constant 0 : index
    %c0_13 = arith.constant 0 : index
    %15 = vector.load %arg4[%c0_11, %c0_12, %c0_13] : memref<4x8x8xf32, #tpu.memory_space<vmem>>, vector<4x8x8xf32>
    tpu.vector_store %arg4[%c0_11, %c0_12, %c0_13], %14 {strides = array<i32>} : memref<4x8x8xf32, #tpu.memory_space<vmem>>, vector<4x8x8xf32>,
    return
  }
  func.func @transform_0(%arg0: i32) -> (i32, i32, i32) {
    %c0_i32 = arith.constant 0 : i32
    %c0_i32_0 = arith.constant 0 : i32
    %c0_i32_1 = arith.constant 0 : i32
    return %arg0, %c0_i32, %c0_i32_0 : i32, i32, i32
  }
  func.func @transform_1(%arg0: i32) -> (i32, i32, i32) {
    %c0_i32 = arith.constant 0 : i32
    %c0_i32_0 = arith.constant 0 : i32
    %c0_i32_1 = arith.constant 0 : i32
    return %arg0, %c0_i32, %c0_i32_0 : i32, i32, i32
  }
  func.func @transform_2(%arg0: i32) -> (i32, i32, i32) {
    %c0_i32 = arith.constant 0 : i32
    %c0_i32_0 = arith.constant 0 : i32
    %c0_i32_1 = arith.constant 0 : i32
    return %arg0, %c0_i32, %c0_i32_0 : i32, i32, i32
  }
  func.func @transform_3(%arg0: i32) -> (i32, i32, i32) {
    %c0_i32 = arith.constant 0 : i32
    %c0_i32_0 = arith.constant 0 : i32
    %c0_i32_1 = arith.constant 0 : i32
    return %arg0, %c0_i32, %c0_i32_0 : i32, i32, i32
  }
}

module attributes {stable_mosaic.version = 11 : i64} {
  func.func @_ln_matmul_kernel(%arg0: i32, %arg1: i32, %arg2: memref<16x32xf32, #tpu.memory_space<vmem>>, %arg3: memref<1x32xf32, #tpu.memory_space<vmem>>, %arg4: memref<1x32xf32, #tpu.memory_space<vmem>>, %arg5: memref<32x96xf32, #tpu.memory_space<vmem>>, %arg6: memref<1x96xf32, #tpu.memory_space<vmem>>, %arg7: memref<16x96xf32, #tpu.memory_space<vmem>>) attributes {dimension_semantics = [#tpu.dimension_semantics<parallel>, #tpu.dimension_semantics<parallel>], iteration_bounds = array<i64: 1, 1>, scalar_prefetch = 0 : i64, scratch_operands = 0 : i64, tpu.core_type = #tpu.core_type<tc>, window_params = [{transform_indices = @transform_0, window_bounds = array<i64: 16, 32>}, {pipeline_mode = #tpu.pipeline_mode<synchronous>, transform_indices = @transform_1, window_bounds = array<i64: 1, 32>}, {pipeline_mode = #tpu.pipeline_mode<synchronous>, transform_indices = @transform_2, window_bounds = array<i64: 1, 32>}, {transform_indices = @transform_3, window_bounds = array<i64: 32, 96>}, {transform_indices = @transform_4, window_bounds = array<i64: 1, 96>}, {transform_indices = @transform_5, window_bounds = array<i64: 16, 96>}]} {
    %c0 = arith.constant 0 : index
    %c0_0 = arith.constant 0 : index
    %0 = vector.load %arg2[%c0, %c0_0] : memref<16x32xf32, #tpu.memory_space<vmem>>, vector<16x32xf32>
    %cst = arith.constant dense<0.000000e+00> : vector<16xf32>
    %1 = vector.multi_reduction <add>, %0, %cst [1] : vector<16x32xf32> to vector<16xf32>
    %2 = vector.shape_cast %1 : vector<16xf32> to vector<16x1xf32>
    %cst_1 = arith.constant 3.200000e+01 : f32
    %3 = vector.broadcast %cst_1 : f32 to vector<16x1xf32>
    %4 = arith.divf %2, %3 : vector<16x1xf32>
    %5 = vector.broadcast %4 : vector<16x1xf32> to vector<16x32xf32>
    %6 = arith.subf %0, %5 : vector<16x32xf32>
    %7 = arith.mulf %6, %6 : vector<16x32xf32>
    %cst_2 = arith.constant dense<0.000000e+00> : vector<16xf32>
    %8 = vector.multi_reduction <add>, %7, %cst_2 [1] : vector<16x32xf32> to vector<16xf32>
    %9 = vector.shape_cast %8 : vector<16xf32> to vector<16x1xf32>
    %cst_3 = arith.constant 3.200000e+01 : f32
    %10 = vector.broadcast %cst_3 : f32 to vector<16x1xf32>
    %11 = arith.divf %9, %10 : vector<16x1xf32>
    %12 = vector.broadcast %4 : vector<16x1xf32> to vector<16x32xf32>
    %13 = arith.subf %0, %12 : vector<16x32xf32>
    %cst_4 = arith.constant 9.99999974E-6 : f32
    %14 = vector.broadcast %cst_4 : f32 to vector<16x1xf32>
    %15 = arith.addf %11, %14 : vector<16x1xf32>
    %16 = math.rsqrt %15 : vector<16x1xf32>
    %17 = vector.broadcast %16 : vector<16x1xf32> to vector<16x32xf32>
    %18 = arith.mulf %13, %17 : vector<16x32xf32>
    %c0_5 = arith.constant 0 : index
    %c0_6 = arith.constant 0 : index
    %19 = vector.load %arg3[%c0_5, %c0_6] : memref<1x32xf32, #tpu.memory_space<vmem>>, vector<1x32xf32>
    %20 = vector.broadcast %19 : vector<1x32xf32> to vector<16x32xf32>
    %21 = arith.mulf %18, %20 : vector<16x32xf32>
    %c0_7 = arith.constant 0 : index
    %c0_8 = arith.constant 0 : index
    %22 = vector.load %arg4[%c0_7, %c0_8] : memref<1x32xf32, #tpu.memory_space<vmem>>, vector<1x32xf32>
    %23 = vector.broadcast %22 : vector<1x32xf32> to vector<16x32xf32>
    %24 = arith.addf %21, %23 : vector<16x32xf32>
    %c0_9 = arith.constant 0 : index
    %c0_10 = arith.constant 0 : index
    %25 = vector.load %arg5[%c0_9, %c0_10] : memref<32x96xf32, #tpu.memory_space<vmem>>, vector<32x96xf32>
    %cst_11 = arith.constant dense<0.000000e+00> : vector<16x96xf32>
    %26 = tpu.matmul %24, %25, %cst_11 {dimension_numbers = #tpu.dot_dimension_numbers<[1], [0], [0], [1], [0, 0, 1, 1], [], []>} : vector<16x32xf32>, vector<32x96xf32>, vector<16x96xf32> -> vector<16x96xf32>
    %c0_12 = arith.constant 0 : index
    %c0_13 = arith.constant 0 : index
    %27 = vector.load %arg6[%c0_12, %c0_13] : memref<1x96xf32, #tpu.memory_space<vmem>>, vector<1x96xf32>
    %28 = vector.broadcast %27 : vector<1x96xf32> to vector<16x96xf32>
    %29 = arith.addf %26, %28 : vector<16x96xf32>
    %c0_14 = arith.constant 0 : index
    %c0_15 = arith.constant 0 : index
    %30 = vector.load %arg7[%c0_14, %c0_15] : memref<16x96xf32, #tpu.memory_space<vmem>>, vector<16x96xf32>
    tpu.vector_store %arg7[%c0_14, %c0_15], %29 {strides = array<i32>} : memref<16x96xf32, #tpu.memory_space<vmem>>, vector<16x96xf32>,
    return
  }
  func.func @transform_0(%arg0: i32, %arg1: i32) -> (i32, i32) {
    %c0_i32 = arith.constant 0 : i32
    %c0_i32_0 = arith.constant 0 : i32
    return %arg0, %c0_i32 : i32, i32
  }
  func.func @transform_1(%arg0: i32, %arg1: i32) -> (i32, i32) {
    %c0_i32 = arith.constant 0 : i32
    %c0_i32_0 = arith.constant 0 : i32
    %c0_i32_1 = arith.constant 0 : i32
    return %c0_i32, %c0_i32_0 : i32, i32
  }
  func.func @transform_2(%arg0: i32, %arg1: i32) -> (i32, i32) {
    %c0_i32 = arith.constant 0 : i32
    %c0_i32_0 = arith.constant 0 : i32
    %c0_i32_1 = arith.constant 0 : i32
    return %c0_i32, %c0_i32_0 : i32, i32
  }
  func.func @transform_3(%arg0: i32, %arg1: i32) -> (i32, i32) {
    %c0_i32 = arith.constant 0 : i32
    %c0_i32_0 = arith.constant 0 : i32
    return %c0_i32, %arg1 : i32, i32
  }
  func.func @transform_4(%arg0: i32, %arg1: i32) -> (i32, i32) {
    %c0_i32 = arith.constant 0 : i32
    %c0_i32_0 = arith.constant 0 : i32
    return %c0_i32, %arg1 : i32, i32
  }
  func.func @transform_5(%arg0: i32, %arg1: i32) -> (i32, i32) {
    %c0_i32 = arith.constant 0 : i32
    return %arg0, %arg1 : i32, i32
  }
}

module attributes {stable_mosaic.version = 11 : i64} {
  func.func @_outproj_res_ln_kernel(%arg0: i32, %arg1: i32, %arg2: memref<16x32xf32, #tpu.memory_space<vmem>>, %arg3: memref<16x32xf32, #tpu.memory_space<vmem>>, %arg4: memref<32x32xf32, #tpu.memory_space<vmem>>, %arg5: memref<1x32xf32, #tpu.memory_space<vmem>>, %arg6: memref<1x32xf32, #tpu.memory_space<vmem>>, %arg7: memref<1x32xf32, #tpu.memory_space<vmem>>, %arg8: memref<16x32xf32, #tpu.memory_space<vmem>>, %arg9: memref<16x32xf32, #tpu.memory_space<vmem>>, %arg10: memref<16x32xf32, #tpu.memory_space<vmem>>) attributes {dimension_semantics = [#tpu.dimension_semantics<parallel>, #tpu.dimension_semantics<arbitrary>], iteration_bounds = array<i64: 1, 1>, scalar_prefetch = 0 : i64, scratch_operands = 1 : i64, tpu.core_type = #tpu.core_type<tc>, window_params = [{transform_indices = @transform_0, window_bounds = array<i64: 16, 32>}, {transform_indices = @transform_1, window_bounds = array<i64: 16, 32>}, {transform_indices = @transform_2, window_bounds = array<i64: 32, 32>}, {pipeline_mode = #tpu.pipeline_mode<synchronous>, transform_indices = @transform_3, window_bounds = array<i64: 1, 32>}, {pipeline_mode = #tpu.pipeline_mode<synchronous>, transform_indices = @transform_4, window_bounds = array<i64: 1, 32>}, {pipeline_mode = #tpu.pipeline_mode<synchronous>, transform_indices = @transform_5, window_bounds = array<i64: 1, 32>}, {transform_indices = @transform_6, window_bounds = array<i64: 16, 32>}, {transform_indices = @transform_7, window_bounds = array<i64: 16, 32>}]} {
    %c0_i32 = arith.constant 0 : i32
    %0 = arith.cmpi eq, %arg1, %c0_i32 : i32
    %1 = arith.extui %0 : i1 to i32
    %c0_i32_0 = arith.constant 0 : i32
    %2 = arith.cmpi ne, %1, %c0_i32_0 : i32
    scf.if %2 {
      %cst_10 = arith.constant 0.000000e+00 : f32
      %12 = vector.broadcast %cst_10 : f32 to vector<16x32xf32>
      %c0_11 = arith.constant 0 : index
      %c0_12 = arith.constant 0 : index
      %13 = vector.load %arg10[%c0_11, %c0_12] : memref<16x32xf32, #tpu.memory_space<vmem>>, vector<16x32xf32>
      tpu.vector_store %arg10[%c0_11, %c0_12], %12 {strides = array<i32>} : memref<16x32xf32, #tpu.memory_space<vmem>>, vector<16x32xf32>,
    } else {
    }
    %c0 = arith.constant 0 : index
    %c0_1 = arith.constant 0 : index
    %3 = vector.load %arg10[%c0, %c0_1] : memref<16x32xf32, #tpu.memory_space<vmem>>, vector<16x32xf32>
    %c0_2 = arith.constant 0 : index
    %c0_3 = arith.constant 0 : index
    %4 = vector.load %arg2[%c0_2, %c0_3] : memref<16x32xf32, #tpu.memory_space<vmem>>, vector<16x32xf32>
    %c0_4 = arith.constant 0 : index
    %c0_5 = arith.constant 0 : index
    %5 = vector.load %arg4[%c0_4, %c0_5] : memref<32x32xf32, #tpu.memory_space<vmem>>, vector<32x32xf32>
    %cst = arith.constant dense<0.000000e+00> : vector<16x32xf32>
    %6 = tpu.matmul %4, %5, %cst {dimension_numbers = #tpu.dot_dimension_numbers<[1], [0], [0], [1], [0, 0, 1, 1], [], []>} : vector<16x32xf32>, vector<32x32xf32>, vector<16x32xf32> -> vector<16x32xf32>
    %7 = arith.addf %3, %6 : vector<16x32xf32>
    %c0_6 = arith.constant 0 : index
    %c0_7 = arith.constant 0 : index
    %8 = vector.load %arg10[%c0_6, %c0_7] : memref<16x32xf32, #tpu.memory_space<vmem>>, vector<16x32xf32>
    tpu.vector_store %arg10[%c0_6, %c0_7], %7 {strides = array<i32>} : memref<16x32xf32, #tpu.memory_space<vmem>>, vector<16x32xf32>,
    %c0_i32_8 = arith.constant 0 : i32
    %9 = arith.cmpi eq, %arg1, %c0_i32_8 : i32
    %10 = arith.extui %9 : i1 to i32
    %c0_i32_9 = arith.constant 0 : i32
    %11 = arith.cmpi ne, %10, %c0_i32_9 : i32
    scf.if %11 {
      %c0_10 = arith.constant 0 : index
      %c0_11 = arith.constant 0 : index
      %12 = vector.load %arg10[%c0_10, %c0_11] : memref<16x32xf32, #tpu.memory_space<vmem>>, vector<16x32xf32>
      %c0_12 = arith.constant 0 : index
      %c0_13 = arith.constant 0 : index
      %13 = vector.load %arg5[%c0_12, %c0_13] : memref<1x32xf32, #tpu.memory_space<vmem>>, vector<1x32xf32>
      %14 = vector.broadcast %13 : vector<1x32xf32> to vector<16x32xf32>
      %15 = arith.addf %12, %14 : vector<16x32xf32>
      %c0_14 = arith.constant 0 : index
      %c0_15 = arith.constant 0 : index
      %16 = vector.load %arg3[%c0_14, %c0_15] : memref<16x32xf32, #tpu.memory_space<vmem>>, vector<16x32xf32>
      %17 = arith.addf %15, %16 : vector<16x32xf32>
      %c0_16 = arith.constant 0 : index
      %c0_17 = arith.constant 0 : index
      %18 = vector.load %arg8[%c0_16, %c0_17] : memref<16x32xf32, #tpu.memory_space<vmem>>, vector<16x32xf32>
      tpu.vector_store %arg8[%c0_16, %c0_17], %17 {strides = array<i32>} : memref<16x32xf32, #tpu.memory_space<vmem>>, vector<16x32xf32>,
      %cst_18 = arith.constant dense<0.000000e+00> : vector<16xf32>
      %19 = vector.multi_reduction <add>, %17, %cst_18 [1] : vector<16x32xf32> to vector<16xf32>
      %20 = vector.shape_cast %19 : vector<16xf32> to vector<16x1xf32>
      %cst_19 = arith.constant 3.200000e+01 : f32
      %21 = vector.broadcast %cst_19 : f32 to vector<16x1xf32>
      %22 = arith.divf %20, %21 : vector<16x1xf32>
      %23 = vector.broadcast %22 : vector<16x1xf32> to vector<16x32xf32>
      %24 = arith.subf %17, %23 : vector<16x32xf32>
      %25 = arith.mulf %24, %24 : vector<16x32xf32>
      %cst_20 = arith.constant dense<0.000000e+00> : vector<16xf32>
      %26 = vector.multi_reduction <add>, %25, %cst_20 [1] : vector<16x32xf32> to vector<16xf32>
      %27 = vector.shape_cast %26 : vector<16xf32> to vector<16x1xf32>
      %cst_21 = arith.constant 3.200000e+01 : f32
      %28 = vector.broadcast %cst_21 : f32 to vector<16x1xf32>
      %29 = arith.divf %27, %28 : vector<16x1xf32>
      %30 = vector.broadcast %22 : vector<16x1xf32> to vector<16x32xf32>
      %31 = arith.subf %17, %30 : vector<16x32xf32>
      %cst_22 = arith.constant 9.99999974E-6 : f32
      %32 = vector.broadcast %cst_22 : f32 to vector<16x1xf32>
      %33 = arith.addf %29, %32 : vector<16x1xf32>
      %34 = math.rsqrt %33 : vector<16x1xf32>
      %35 = vector.broadcast %34 : vector<16x1xf32> to vector<16x32xf32>
      %36 = arith.mulf %31, %35 : vector<16x32xf32>
      %c0_23 = arith.constant 0 : index
      %c0_24 = arith.constant 0 : index
      %37 = vector.load %arg6[%c0_23, %c0_24] : memref<1x32xf32, #tpu.memory_space<vmem>>, vector<1x32xf32>
      %38 = vector.broadcast %37 : vector<1x32xf32> to vector<16x32xf32>
      %39 = arith.mulf %36, %38 : vector<16x32xf32>
      %c0_25 = arith.constant 0 : index
      %c0_26 = arith.constant 0 : index
      %40 = vector.load %arg7[%c0_25, %c0_26] : memref<1x32xf32, #tpu.memory_space<vmem>>, vector<1x32xf32>
      %41 = vector.broadcast %40 : vector<1x32xf32> to vector<16x32xf32>
      %42 = arith.addf %39, %41 : vector<16x32xf32>
      %c0_27 = arith.constant 0 : index
      %c0_28 = arith.constant 0 : index
      %43 = vector.load %arg9[%c0_27, %c0_28] : memref<16x32xf32, #tpu.memory_space<vmem>>, vector<16x32xf32>
      tpu.vector_store %arg9[%c0_27, %c0_28], %42 {strides = array<i32>} : memref<16x32xf32, #tpu.memory_space<vmem>>, vector<16x32xf32>,
    } else {
    }
    return
  }
  func.func @transform_0(%arg0: i32, %arg1: i32) -> (i32, i32) {
    %c0_i32 = arith.constant 0 : i32
    return %arg0, %arg1 : i32, i32
  }
  func.func @transform_1(%arg0: i32, %arg1: i32) -> (i32, i32) {
    %c0_i32 = arith.constant 0 : i32
    %c0_i32_0 = arith.constant 0 : i32
    return %arg0, %c0_i32 : i32, i32
  }
  func.func @transform_2(%arg0: i32, %arg1: i32) -> (i32, i32) {
    %c0_i32 = arith.constant 0 : i32
    %c0_i32_0 = arith.constant 0 : i32
    return %arg1, %c0_i32 : i32, i32
  }
  func.func @transform_3(%arg0: i32, %arg1: i32) -> (i32, i32) {
    %c0_i32 = arith.constant 0 : i32
    %c0_i32_0 = arith.constant 0 : i32
    %c0_i32_1 = arith.constant 0 : i32
    return %c0_i32, %c0_i32_0 : i32, i32
  }
  func.func @transform_4(%arg0: i32, %arg1: i32) -> (i32, i32) {
    %c0_i32 = arith.constant 0 : i32
    %c0_i32_0 = arith.constant 0 : i32
    %c0_i32_1 = arith.constant 0 : i32
    return %c0_i32, %c0_i32_0 : i32, i32
  }
  func.func @transform_5(%arg0: i32, %arg1: i32) -> (i32, i32) {
    %c0_i32 = arith.constant 0 : i32
    %c0_i32_0 = arith.constant 0 : i32
    %c0_i32_1 = arith.constant 0 : i32
    return %c0_i32, %c0_i32_0 : i32, i32
  }
  func.func @transform_6(%arg0: i32, %arg1: i32) -> (i32, i32) {
    %c0_i32 = arith.constant 0 : i32
    %c0_i32_0 = arith.constant 0 : i32
    return %arg0, %c0_i32 : i32, i32
  }
  func.func @transform_7(%arg0: i32, %arg1: i32) -> (i32, i32) {
    %c0_i32 = arith.constant 0 : i32
    %c0_i32_0 = arith.constant 0 : i32
    return %arg0, %c0_i32 : i32, i32
  }
}

module attributes {stable_mosaic.version = 11 : i64} {
  func.func @_moe_kernel(%arg0: i32, %arg1: i32, %arg2: memref<16x32xf32, #tpu.memory_space<vmem>>, %arg3: memref<16x32xf32, #tpu.memory_space<vmem>>, %arg4: memref<32x4xf32, #tpu.memory_space<vmem>>, %arg5: memref<1x32x64xf32, #tpu.memory_space<vmem>>, %arg6: memref<1x1x64xf32, #tpu.memory_space<vmem>>, %arg7: memref<1x64x32xf32, #tpu.memory_space<vmem>>, %arg8: memref<1x1x32xf32, #tpu.memory_space<vmem>>, %arg9: memref<16x32xf32, #tpu.memory_space<vmem>>, %arg10: memref<16x32xf32, #tpu.memory_space<vmem>>, %arg11: memref<16x1xf32, #tpu.memory_space<vmem>>, %arg12: memref<16x1xi32, #tpu.memory_space<vmem>>) attributes {dimension_semantics = [#tpu.dimension_semantics<parallel>, #tpu.dimension_semantics<arbitrary>], iteration_bounds = array<i64: 1, 4>, scalar_prefetch = 0 : i64, scratch_operands = 3 : i64, tpu.core_type = #tpu.core_type<tc>, window_params = [{transform_indices = @transform_0, window_bounds = array<i64: 16, 32>}, {transform_indices = @transform_1, window_bounds = array<i64: 16, 32>}, {pipeline_mode = #tpu.pipeline_mode<synchronous>, transform_indices = @transform_2, window_bounds = array<i64: 32, 4>}, {transform_indices = @transform_3, window_bounds = array<i64: 1, 32, 64>}, {transform_indices = @transform_4, window_bounds = array<i64: 1, 1, 64>}, {transform_indices = @transform_5, window_bounds = array<i64: 1, 64, 32>}, {transform_indices = @transform_6, window_bounds = array<i64: 1, 1, 32>}, {transform_indices = @transform_7, window_bounds = array<i64: 16, 32>}]} {
    %c0_i32 = arith.constant 0 : i32
    %0 = arith.cmpi eq, %arg1, %c0_i32 : i32
    %1 = arith.extui %0 : i1 to i32
    %c0_i32_0 = arith.constant 0 : i32
    %2 = arith.cmpi ne, %1, %c0_i32_0 : i32
    scf.if %2 {
      %cst_26 = arith.constant 0.000000e+00 : f32
      %34 = vector.broadcast %cst_26 : f32 to vector<16x32xf32>
      %c0_27 = arith.constant 0 : index
      %c0_28 = arith.constant 0 : index
      %35 = vector.load %arg10[%c0_27, %c0_28] : memref<16x32xf32, #tpu.memory_space<vmem>>, vector<16x32xf32>
      tpu.vector_store %arg10[%c0_27, %c0_28], %34 {strides = array<i32>} : memref<16x32xf32, #tpu.memory_space<vmem>>, vector<16x32xf32>,
      %c0_29 = arith.constant 0 : index
      %c0_30 = arith.constant 0 : index
      %36 = vector.load %arg2[%c0_29, %c0_30] : memref<16x32xf32, #tpu.memory_space<vmem>>, vector<16x32xf32>
      %c0_31 = arith.constant 0 : index
      %c0_32 = arith.constant 0 : index
      %37 = vector.load %arg4[%c0_31, %c0_32] : memref<32x4xf32, #tpu.memory_space<vmem>>, vector<32x4xf32>
      %cst_33 = arith.constant dense<0.000000e+00> : vector<16x4xf32>
      %38 = tpu.matmul %36, %37, %cst_33 {dimension_numbers = #tpu.dot_dimension_numbers<[1], [0], [0], [1], [0, 0, 1, 1], [], []>} : vector<16x32xf32>, vector<32x4xf32>, vector<16x4xf32> -> vector<16x4xf32>
      %cst_34 = arith.constant dense<0xFF800000> : vector<16xf32>
      %39 = vector.multi_reduction <maximumf>, %38, %cst_34 [1] : vector<16x4xf32> to vector<16xf32>
      %cst_35 = arith.constant 0xFF800000 : f32
      %40 = vector.broadcast %cst_35 : f32 to vector<16xf32>
      %41 = arith.maximumf %40, %39 : vector<16xf32>
      %42 = vector.shape_cast %41 : vector<16xf32> to vector<16x1xf32>
      %43 = vector.broadcast %42 : vector<16x1xf32> to vector<16x4xf32>
      %44 = arith.subf %38, %43 : vector<16x4xf32>
      %45 = math.exp %44 : vector<16x4xf32>
      %cst_36 = arith.constant dense<0.000000e+00> : vector<16xf32>
      %46 = vector.multi_reduction <add>, %45, %cst_36 [1] : vector<16x4xf32> to vector<16xf32>
      %47 = vector.shape_cast %46 : vector<16xf32> to vector<16x1xf32>
      %48 = vector.broadcast %47 : vector<16x1xf32> to vector<16x4xf32>
      %49 = arith.divf %45, %48 : vector<16x4xf32>
      %cst_37 = arith.constant dense<0xFF800000> : vector<16xf32>
      %50 = vector.multi_reduction <maximumf>, %49, %cst_37 [1] : vector<16x4xf32> to vector<16xf32>
      %51 = vector.shape_cast %50 : vector<16xf32> to vector<16x1xf32>
      %52 = tpu.iota {dimensions = array<i32: 1>} : vector<16x4xi32>
      %53 = vector.broadcast %51 : vector<16x1xf32> to vector<16x4xf32>
      %54 = arith.cmpf oge, %49, %53 : vector<16x4xf32>
      %c4_i32 = arith.constant 4 : i32
      %55 = vector.broadcast %c4_i32 : i32 to vector<16x4xi32>
      %56 = arith.select %54, %52, %55 : vector<16x4xi1>, vector<16x4xi32>
      %cst_38 = arith.constant dense<2147483647> : vector<16xi32>
      %57 = vector.multi_reduction <minsi>, %56, %cst_38 [1] : vector<16x4xi32> to vector<16xi32>
      %58 = vector.shape_cast %57 : vector<16xi32> to vector<16x1xi32>
      %c0_39 = arith.constant 0 : index
      %c0_40 = arith.constant 0 : index
      %59 = vector.load %arg11[%c0_39, %c0_40] : memref<16x1xf32, #tpu.memory_space<vmem>>, vector<16x1xf32>
      tpu.vector_store %arg11[%c0_39, %c0_40], %51 {strides = array<i32>} : memref<16x1xf32, #tpu.memory_space<vmem>>, vector<16x1xf32>,
      %c0_41 = arith.constant 0 : index
      %c0_42 = arith.constant 0 : index
      %60 = vector.load %arg12[%c0_41, %c0_42] : memref<16x1xi32, #tpu.memory_space<vmem>>, vector<16x1xi32>
      tpu.vector_store %arg12[%c0_41, %c0_42], %58 {strides = array<i32>} : memref<16x1xi32, #tpu.memory_space<vmem>>, vector<16x1xi32>,
    } else {
    }
    %c0 = arith.constant 0 : index
    %c0_1 = arith.constant 0 : index
    %3 = vector.load %arg12[%c0, %c0_1] : memref<16x1xi32, #tpu.memory_space<vmem>>, vector<16x1xi32>
    %4 = vector.broadcast %arg1 : i32 to vector<16x1xi32>
    %5 = arith.cmpi eq, %3, %4 : vector<16x1xi32>
    %c0_2 = arith.constant 0 : index
    %c0_3 = arith.constant 0 : index
    %6 = vector.load %arg11[%c0_2, %c0_3] : memref<16x1xf32, #tpu.memory_space<vmem>>, vector<16x1xf32>
    %cst = arith.constant 0.000000e+00 : f32
    %7 = vector.broadcast %cst : f32 to vector<16x1xf32>
    %8 = arith.select %5, %6, %7 : vector<16x1xi1>, vector<16x1xf32>
    %c0_4 = arith.constant 0 : index
    %c0_5 = arith.constant 0 : index
    %9 = vector.load %arg2[%c0_4, %c0_5] : memref<16x32xf32, #tpu.memory_space<vmem>>, vector<16x32xf32>
    %c0_6 = arith.constant 0 : index
    %c0_7 = arith.constant 0 : index
    %c0_8 = arith.constant 0 : index
    %10 = vector.load %arg5[%c0_6, %c0_7, %c0_8] : memref<1x32x64xf32, #tpu.memory_space<vmem>>, vector<1x32x64xf32>
    %11 = vector.shape_cast %10 : vector<1x32x64xf32> to vector<32x64xf32>
    %cst_9 = arith.constant dense<0.000000e+00> : vector<16x64xf32>
    %12 = tpu.matmul %9, %11, %cst_9 {dimension_numbers = #tpu.dot_dimension_numbers<[1], [0], [0], [1], [0, 0, 1, 1], [], []>} : vector<16x32xf32>, vector<32x64xf32>, vector<16x64xf32> -> vector<16x64xf32>
    %c0_10 = arith.constant 0 : index
    %c0_11 = arith.constant 0 : index
    %c0_12 = arith.constant 0 : index
    %13 = vector.load %arg6[%c0_10, %c0_11, %c0_12] : memref<1x1x64xf32, #tpu.memory_space<vmem>>, vector<1x1x64xf32>
    %14 = vector.shape_cast %13 : vector<1x1x64xf32> to vector<1x64xf32>
    %15 = vector.broadcast %14 : vector<1x64xf32> to vector<16x64xf32>
    %16 = arith.addf %12, %15 : vector<16x64xf32>
    %cst_13 = arith.constant 0.000000e+00 : f32
    %17 = vector.broadcast %cst_13 : f32 to vector<16x64xf32>
    %18 = arith.maximumf %16, %17 : vector<16x64xf32>
    %c0_14 = arith.constant 0 : index
    %c0_15 = arith.constant 0 : index
    %c0_16 = arith.constant 0 : index
    %19 = vector.load %arg7[%c0_14, %c0_15, %c0_16] : memref<1x64x32xf32, #tpu.memory_space<vmem>>, vector<1x64x32xf32>
    %20 = vector.shape_cast %19 : vector<1x64x32xf32> to vector<64x32xf32>
    %cst_17 = arith.constant dense<0.000000e+00> : vector<16x32xf32>
    %21 = tpu.matmul %18, %20, %cst_17 {dimension_numbers = #tpu.dot_dimension_numbers<[1], [0], [0], [1], [0, 0, 1, 1], [], []>} : vector<16x64xf32>, vector<64x32xf32>, vector<16x32xf32> -> vector<16x32xf32>
    %c0_18 = arith.constant 0 : index
    %c0_19 = arith.constant 0 : index
    %c0_20 = arith.constant 0 : index
    %22 = vector.load %arg8[%c0_18, %c0_19, %c0_20] : memref<1x1x32xf32, #tpu.memory_space<vmem>>, vector<1x1x32xf32>
    %23 = vector.shape_cast %22 : vector<1x1x32xf32> to vector<1x32xf32>
    %24 = vector.broadcast %23 : vector<1x32xf32> to vector<16x32xf32>
    %25 = arith.addf %21, %24 : vector<16x32xf32>
    %c0_21 = arith.constant 0 : index
    %c0_22 = arith.constant 0 : index
    %26 = vector.load %arg10[%c0_21, %c0_22] : memref<16x32xf32, #tpu.memory_space<vmem>>, vector<16x32xf32>
    %27 = vector.broadcast %8 : vector<16x1xf32> to vector<16x32xf32>
    %28 = arith.mulf %27, %25 : vector<16x32xf32>
    %29 = arith.addf %26, %28 : vector<16x32xf32>
    %c0_23 = arith.constant 0 : index
    %c0_24 = arith.constant 0 : index
    %30 = vector.load %arg10[%c0_23, %c0_24] : memref<16x32xf32, #tpu.memory_space<vmem>>, vector<16x32xf32>
    tpu.vector_store %arg10[%c0_23, %c0_24], %29 {strides = array<i32>} : memref<16x32xf32, #tpu.memory_space<vmem>>, vector<16x32xf32>,
    %c3_i32 = arith.constant 3 : i32
    %31 = arith.cmpi eq, %arg1, %c3_i32 : i32
    %32 = arith.extui %31 : i1 to i32
    %c0_i32_25 = arith.constant 0 : i32
    %33 = arith.cmpi ne, %32, %c0_i32_25 : i32
    scf.if %33 {
      %c0_26 = arith.constant 0 : index
      %c0_27 = arith.constant 0 : index
      %34 = vector.load %arg3[%c0_26, %c0_27] : memref<16x32xf32, #tpu.memory_space<vmem>>, vector<16x32xf32>
      %c0_28 = arith.constant 0 : index
      %c0_29 = arith.constant 0 : index
      %35 = vector.load %arg10[%c0_28, %c0_29] : memref<16x32xf32, #tpu.memory_space<vmem>>, vector<16x32xf32>
      %36 = arith.addf %34, %35 : vector<16x32xf32>
      %c0_30 = arith.constant 0 : index
      %c0_31 = arith.constant 0 : index
      %37 = vector.load %arg9[%c0_30, %c0_31] : memref<16x32xf32, #tpu.memory_space<vmem>>, vector<16x32xf32>
      tpu.vector_store %arg9[%c0_30, %c0_31], %36 {strides = array<i32>} : memref<16x32xf32, #tpu.memory_space<vmem>>, vector<16x32xf32>,
    } else {
    }
    return
  }
  func.func @transform_0(%arg0: i32, %arg1: i32) -> (i32, i32) {
    %c0_i32 = arith.constant 0 : i32
    %c0_i32_0 = arith.constant 0 : i32
    return %arg0, %c0_i32 : i32, i32
  }
  func.func @transform_1(%arg0: i32, %arg1: i32) -> (i32, i32) {
    %c0_i32 = arith.constant 0 : i32
    %c0_i32_0 = arith.constant 0 : i32
    return %arg0, %c0_i32 : i32, i32
  }
  func.func @transform_2(%arg0: i32, %arg1: i32) -> (i32, i32) {
    %c0_i32 = arith.constant 0 : i32
    %c0_i32_0 = arith.constant 0 : i32
    %c0_i32_1 = arith.constant 0 : i32
    return %c0_i32, %c0_i32_0 : i32, i32
  }
  func.func @transform_3(%arg0: i32, %arg1: i32) -> (i32, i32, i32) {
    %c0_i32 = arith.constant 0 : i32
    %c0_i32_0 = arith.constant 0 : i32
    %c0_i32_1 = arith.constant 0 : i32
    return %arg1, %c0_i32, %c0_i32_0 : i32, i32, i32
  }
  func.func @transform_4(%arg0: i32, %arg1: i32) -> (i32, i32, i32) {
    %c0_i32 = arith.constant 0 : i32
    %c0_i32_0 = arith.constant 0 : i32
    %c0_i32_1 = arith.constant 0 : i32
    return %arg1, %c0_i32, %c0_i32_0 : i32, i32, i32
  }
  func.func @transform_5(%arg0: i32, %arg1: i32) -> (i32, i32, i32) {
    %c0_i32 = arith.constant 0 : i32
    %c0_i32_0 = arith.constant 0 : i32
    %c0_i32_1 = arith.constant 0 : i32
    return %arg1, %c0_i32, %c0_i32_0 : i32, i32, i32
  }
  func.func @transform_6(%arg0: i32, %arg1: i32) -> (i32, i32, i32) {
    %c0_i32 = arith.constant 0 : i32
    %c0_i32_0 = arith.constant 0 : i32
    %c0_i32_1 = arith.constant 0 : i32
    return %arg1, %c0_i32, %c0_i32_0 : i32, i32, i32
  }
  func.func @transform_7(%arg0: i32, %arg1: i32) -> (i32, i32) {
    %c0_i32 = arith.constant 0 : i32
    %c0_i32_0 = arith.constant 0 : i32
    return %arg0, %c0_i32 : i32, i32
  }
}

</mosaic_0001>

<bundles_post_ra>
// kernel: unilm_moe_layer_forward.4
= control target key start
LH: loop header
LB: loop body
LE: loop exit
PB: predicated region body
PF: predicated region fallthrough
CT: control target
= control target key end

     0   :  { %vm22_vm0 = vcmask 261120   ;;  %vm160_vm1 = vcmask 785408   ;;  %s270_s0 = inlined_call_operand.vmem [shape: f32[16,32], index: 0, kind: input, shape index: {}]   ;;  %s271_s3 = inlined_call_operand.vmem [shape: f32[32,96], index: 3, kind: input, shape index: {}]   ;;  %s272_s1 = inlined_call_operand.vmem [shape: f32[1,32], index: 1, kind: input, shape index: {}]   ;;  %s273_s2 = inlined_call_operand.vmem [shape: f32[1,32], index: 2, kind: input, shape index: {}]   ;;  %s274_s4 = inlined_call_operand.vmem [shape: f32[1,96], index: 4, kind: input, shape index: {}]   ;;  %s275_s5 = inlined_call_operand.vmem [shape: f32[16,96], index: 5, kind: output, shape index: {}]  }
   0x1   :  { %v20_v0 = vld [vmem:[%s270_s0] sm:$0xff]  ;;  %v21_v1 = vld [vmem:[%s270_s0 + $0x8] sm:$0xff]  ;;  %v70_v16 = vld [vmem:[%s271_s3 + $0x10] sm:$0xff] }
   0x2   :  { %v23_v2 = vsel %vm22_vm0, %v20_v0, 0.0  ;;  %v26_v3 = vsel %vm22_vm0, %v21_v1, 0.0  ;;  %v68_v14 = vld [vmem:[%s271_s3] sm:$0xff]  ;;  %v69_v15 = vld [vmem:[%s271_s3 + $0x8] sm:$0xff]  ;;  %v71_v18 = vld [vmem:[%s271_s3 + $0x18] sm:$0xff] }
   0x3   :  { %24 = vadd.xlane.f32.xlu0 %v23_v2  ;;  %v189_v17 = vpack.c.bf16 %v69_v15, %v68_v14  ;;  %v193_v19 = vpack.c.bf16 %v71_v18, %v70_v16  ;;  %v167_v27 = vld [vmem:[%s272_s1] ss:$0 sm:$0xff] }
   0x4   :  { %v168_v29 = vld [vmem:[%s273_s2] ss:$0 sm:$0xff] }
   0x5   :  { %190 = vmatprep.subr.bf16.mxu0 %v189_v17  ;;  %v169_v36 = vld [vmem:[%s274_s4] ss:$0 sm:$0xff] }
   0x6   :  { %192 = vmatpush3.bf16.msra.mxu0 %v189_v17 }
   0x7   :  { %27 = vadd.xlane.f32.xlu0 %v26_v3  ;;  %194 = vmatprep.subr.bf16.mxu0 %v193_v19 }
   0xa   :  { %196 = vmatpush3.bf16.msra.mxu0 %v193_v19 }
  0x90   :  { %v25_v4 = vpop.xlane.xlu0 %24 }
  0x91   :  { %v30_v5 = vmul.f32 0.03125, %v25_v4 }
  0x93   :  { %v32_v6 = vsub.f32 %v20_v0, %v30_v5 }
  0x94   :  { %v28_v7 = vpop.xlane.xlu0 %27 }
  0x95   :  { %v31_v8 = vmul.f32 0.03125, %v28_v7  ;;  %v34_v9 = vmul.f32 %v32_v6, %v32_v6 }
  0x97   :  { %v33_v10 = vsub.f32 %v21_v1, %v31_v8  ;;  %v36_v11 = vsel %vm22_vm0, %v34_v9, 0.0 }
  0x98   :  { %37 = vadd.xlane.f32.xlu1 %v36_v11 }
  0x99   :  { %v35_v12 = vmul.f32 %v33_v10, %v33_v10 }
  0x9b   :  { %v39_v13 = vsel %vm22_vm0, %v35_v12, 0.0 }
  0x9c   :  { %40 = vadd.xlane.f32.xlu1 %v39_v13 }
 0x125   :  { %v38_v20 = vpop.xlane.xlu1 %37 }
 0x126   :  { %v42_v21 = vmul.f32 0.03125, %v38_v20 }
 0x128   :  { %v44_v22 = vadd.f32 1e-05, %v42_v21 }
 0x129   :  { %v41_v23 = vpop.xlane.xlu1 %40 }
 0x12a   :  { %197 = vrsqrt.f32 %v44_v22  ;;  %v43_v24 = vmul.f32 0.03125, %v41_v23 }
 0x12c   :  { %v45_v25 = vadd.f32 1e-05, %v43_v24 }
 0x12e   :  { %199 = vrsqrt.f32 %v45_v25 }
 0x134   :  { %v198_v26 = vpop.eup %197 }
 0x135   :  { %v48_v28 = vmul.f32 %v198_v26, %v32_v6 }
 0x137   :  { %v57_v30 = vmul.f32 %v167_v27, %v48_v28 }
 0x138   :  { %v200_v31 = vpop.eup %199 }
 0x139   :  { %v49_v32 = vmul.f32 %v200_v31, %v33_v10  ;;  %v66_v33 = vadd.f32 %v168_v29, %v57_v30 }
 0x13b   :  { %v58_v34 = vmul.f32 %v167_v27, %v49_v32  ;;  %186 = vmatprep.mubr.msk.f32.mxu0 %vm22_vm0, %v66_v33 }
 0x13d   :  { %v67_v35 = vadd.f32 %v168_v29, %v58_v34 }
 0x13f   :  { %187 = vmatmul.mubr.msk.f32.vlgmr.msra.gmra.mrb[0].mxu0 %vm22_vm0, %v67_v35 }
 0x212   :  { %v188_v37 = vpop.f32.mrb[0].mxu0 }
 0x213   :  { %v157_v38 = vadd.f32 %v188_v37, %v169_v36  ;;  %v151_v39 = vpop.f32.mrb[1].mxu0 }
 0x214   :  { %v152_v40 = vadd.f32 %v169_v36, %v151_v39 }
 0x215   :  { %162 = vst.msk [vmem:[%s275_s5 + $0x8] sm:$0xff] %vm160_vm1, %v157_v38 }
 0x216   :  { %161 = vst.msk [vmem:[%s275_s5] sm:$0xff] %vm160_vm1, %v152_v40 }

// kernel: unilm_moe_layer_forward.5
= control target key start
LH: loop header
LB: loop body
LE: loop exit
PB: predicated region body
PF: predicated region fallthrough
CT: control target
= control target key end

     0   :  { %s1094_s12 = smov 0   ;;  %s1171_s0 = inlined_call_operand.vmem [shape: f32[8,8,8], index: 0, kind: input, shape index: {}]   ;;  %s1172_s1 = inlined_call_operand.vmem [shape: f32[8,8,8], index: 1, kind: input, shape index: {}]   ;;  %s1173_s2 = inlined_call_operand.vmem [shape: f32[8,8,8], index: 2, kind: input, shape index: {}]   ;;  %s1174_s3 = inlined_call_operand.vmem [shape: f32[8,8,8], index: 3, kind: output, shape index: {}]  }
   0x1 LB: > { %s955_s13 = sadd.s32 4294967295, %s1070_s12   ;;  %p959_p0 = scmp.ge.s32.totalorder %s1070_s12, 1  ;;  %s1070_s12 = sphi %s1094_s12, %s13_s12  }
   0x2   : > { %p160_p1 = scmp.lt.s32.totalorder %s1070_s12, 3 }
   0x4   : > { %p161_p2 = pnand %p959_p0, %p160_p1 }
   0x5   : > { %s960_s14 = sshll.u32 (!%p161_p2), %s955_s13, 2  ;;  %v1072_v0 = vmov (!%p161_p2), 0.0   ;;  %vm1073_vm0 = vmmov (!%p161_p2), 0   ;;  %vm230_vm1 = vcmask (!%p161_p2), 64512  }
   0x6   : > { %164 = sbr.rel (%p161_p2) target bundleno = 767 (0x2ff), region = 32  ;;  %998 = vmatprep.subr.mxu0 (!%p161_p2), %v1072_v0  ;;  %p195_p3 = scmp.lt.s32.totalorder (!%p161_p2), %s960_s14, 7  ;;  %1000 = vmatprep.mubr.msk.f32.mxu0 (!%p161_p2), %vm1073_vm0, %v1072_v0 }
   0x7   : > { %1003 = vmatprep.subr.mxu1 (!%p161_p2), %v1072_v0  ;;  %1005 = vmatprep.mubr.msk.f32.mxu1 (!%p161_p2), %vm1073_vm0, %v1072_v0 }
   0xd   : > { %s1176_s14 = smov (!%p195_p3, %s960_s14), 7 }
   0xe   : > { %s1108_s15 = sshll.u32 %s1176_s14, 3 }
   0xf   : > { %s204_s18 = scalar_lea.vmem %s1172_s1, %s1108_s15  ;;  %s198_s21 = scalar_lea.vmem %s1171_s0, %s1108_s15 }
  0x10   : > { %v222_v1 = vld [vmem:[%s204_s18] sm:$0xff]  ;;  %v223_v2 = vld [vmem:[%s204_s18 + $0x8] sm:$0xff]  ;;  %v224_v5 = vld [vmem:[%s204_s18 + $0x10] sm:$0xff]  ;;  %s210_s24 = scalar_lea.vmem %s1173_s2, %s1108_s15  ;;  %s216_s27 = scalar_lea.vmem %s1174_s3, %s1108_s15 }
  0x11   : > { %999 = vmatpush3.xpose.msk.msra.mxu0 %vm230_vm1, %v222_v1  ;;  %v218_v3 = vld [vmem:[%s198_s21] sm:$0xff]  ;;  %1004 = vmatpush3.xpose.msk.msra.mxu1 %vm230_vm1, %v223_v2  ;;  %v219_v4 = vld [vmem:[%s198_s21 + $0x8] sm:$0xff]  ;;  %v225_v6 = vld [vmem:[%s204_s18 + $0x18] sm:$0xff] }
  0x12   : > { %1008 = vmatprep.subr.mxu0 %v1072_v0  ;;  %1013 = vmatprep.subr.mxu1 %v1072_v0  ;;  %v220_v7 = vld [vmem:[%s198_s21 + $0x10] sm:$0xff]  ;;  %v221_v8 = vld [vmem:[%s198_s21 + $0x18] sm:$0xff]  ;;  %v226_v41 = vld [vmem:[%s210_s24] sm:$0xff] }
  0x13   : > { %v227_v42 = vld [vmem:[%s210_s24 + $0x8] sm:$0xff]  ;;  %v228_v49 = vld [vmem:[%s210_s24 + $0x10] sm:$0xff]  ;;  %v229_v53 = vld [vmem:[%s210_s24 + $0x18] sm:$0xff] }
  0x14   : > { %1001 = vmatmul.mubr.msk.f32.vlgmr.msra.gmra.mrb[0].mxu0 %vm230_vm1, %v218_v3  ;;  %1006 = vmatmul.mubr.msk.f32.vlgmr.msra.gmra.mrb[0].mxu1 %vm230_vm1, %v219_v4 }
  0x15   : > { %1009 = vmatpush3.xpose.msk.msra.mxu0 %vm230_vm1, %v224_v5  ;;  %1010 = vmatprep.mubr.msk.f32.mxu0 %vm1073_vm0, %v1072_v0 }
  0x16   : > { %1014 = vmatpush3.xpose.msk.msra.mxu1 %vm230_vm1, %v225_v6  ;;  %1015 = vmatprep.mubr.msk.f32.mxu1 %vm1073_vm0, %v1072_v0 }
  0x17   : > { %1018 = vmatprep.subr.mxu0 %v1072_v0  ;;  %1023 = vmatprep.subr.mxu1 %v1072_v0 }
  0x18   : > { %1011 = vmatmul.mubr.msk.f32.vlgmr.msra.gmra.mrb[2].mxu0 %vm230_vm1, %v220_v7 }
  0x19   : > { %1016 = vmatmul.mubr.msk.f32.vlgmr.msra.gmra.mrb[2].mxu1 %vm230_vm1, %v221_v8  ;;  %1020 = vmatprep.mubr.msk.f32.mxu0 %vm1073_vm0, %v1072_v0 }
  0x1a   : > { %1025 = vmatprep.mubr.msk.f32.mxu1 %vm1073_vm0, %v1072_v0  ;;  %1019 = vmatpush3.msra.mxu0 %v226_v41 }
  0x1b   : > { %1028 = vmatprep.subr.mxu0 %v1072_v0  ;;  %1024 = vmatpush3.msra.mxu1 %v227_v42 }
  0x1c   : > { %1033 = vmatprep.subr.mxu1 %v1072_v0 }
  0xe7   : > { %v303_v9 = vpop.f32.mrb[0].mxu0  ;;  %v379_v10 = vpop.f32.mrb[0].mxu1 }
  0xe8   : > { %v1002_v11 = vpop.f32.mrb[1].mxu0  ;;  %v535_v12 = vsel %vm230_vm1, %v303_v9, -inf  ;;  %v1007_v13 = vpop.f32.mrb[1].mxu1  ;;  %v538_v14 = vsel %vm230_vm1, %v379_v10, -inf }
  0xe9   : > { %536 = vmax.xlane.f32.xlu0 %v535_v12 }
  0xeb   : > { %v455_v15 = vpop.f32.mrb[2].mxu0 }
  0xec   : > { %v1012_v16 = vpop.f32.mrb[3].mxu0  ;;  %v541_v17 = vsel %vm230_vm1, %v455_v15, -inf  ;;  %v531_v18 = vpop.f32.mrb[2].mxu1 }
  0xed   : > { %539 = vmax.xlane.f32.xlu0 %v538_v14  ;;  %542 = vmax.xlane.f32.xlu1 %v541_v17  ;;  %v1017_v19 = vpop.f32.mrb[3].mxu1  ;;  %v544_v20 = vsel %vm230_vm1, %v531_v18, -inf }
  0xf1   : > { %545 = vmax.xlane.f32.xlu1 %v544_v20 }
 0x176   : > { %v537_v21 = vpop.xlane.xlu0 %536 }
 0x177   : > { %v547_v22 = vsub.f32 %v303_v9, %v537_v21 }
 0x179   : > { %v551_v23 = vmul.f32 1.442695, %v547_v22 }
 0x17a   : > { %v540_v24 = vpop.xlane.xlu0 %539  ;;  %v543_v25 = vpop.xlane.xlu1 %542 }
 0x17b   : > { %1048 = vpow2.f32 %v551_v23  ;;  %v548_v26 = vsub.f32 %v379_v10, %v540_v24  ;;  %v549_v27 = vsub.f32 %v455_v15, %v543_v25 }
 0x17d   : > { %v553_v28 = vmul.f32 1.442695, %v548_v26  ;;  %v555_v29 = vmul.f32 1.442695, %v549_v27 }
 0x17e   : > { %v546_v30 = vpop.xlane.xlu1 %545 }
 0x17f   : > { %1050 = vpow2.f32 %v553_v28  ;;  %v550_v31 = vsub.f32 %v531_v18, %v546_v30 }
 0x180   : > { %1052 = vpow2.f32 %v555_v29 }
 0x181   : > { %v557_v32 = vmul.f32 1.442695, %v550_v31 }
 0x183   : > { %1054 = vpow2.f32 %v557_v32 }
 0x185   : > { %v1049_v33 = vpop.eup %1048 }
 0x186   : > { %v559_v34 = vsel %vm230_vm1, %v1049_v33, 0.0 }
 0x187   : > { %560 = vadd.xlane.f32.xlu0 %v559_v34 }
 0x189   : > { %v1051_v35 = vpop.eup %1050 }
 0x18a   : > { %v1053_v36 = vpop.eup %1052  ;;  %v562_v37 = vsel %vm230_vm1, %v1051_v35, 0.0 }
 0x18b   : > { %563 = vadd.xlane.f32.xlu1 %v562_v37  ;;  %v565_v38 = vsel %vm230_vm1, %v1053_v36, 0.0 }
 0x18c   : > { %566 = vadd.xlane.f32.xlu0 %v565_v38 }
 0x18d   : > { %v1055_v39 = vpop.eup %1054 }
 0x18e   : > { %v568_v40 = vsel %vm230_vm1, %v1055_v39, 0.0 }
 0x18f   : > { %569 = vadd.xlane.f32.xlu1 %v568_v40 }
 0x214   : > { %v561_v43 = vpop.xlane.xlu0 %560 }
 0x215   : > { %1056 = vrcp.f32 %v561_v43 }
 0x218   : > { %v564_v44 = vpop.xlane.xlu1 %563 }
 0x219   : > { %v567_v45 = vpop.xlane.xlu0 %566  ;;  %1058 = vrcp.f32 %v564_v44 }
 0x21a   : > { %1060 = vrcp.f32 %v567_v45 }
 0x21c   : > { %v570_v46 = vpop.xlane.xlu1 %569 }
 0x21d   : > { %1062 = vrcp.f32 %v570_v46 }
 0x21f   : > { %v1057_v47 = vpop.eup %1056 }
 0x220   : > { %v575_v48 = vmul.f32 %v1057_v47, %v1049_v33 }
 0x222   : > { %1021 = vmatmul.mubr.msk.f32.vlgmr.msra.gmra.mrb[4].mxu0 %vm230_vm1, %v575_v48 }
 0x223   : > { %v1059_v50 = vpop.eup %1058  ;;  %1029 = vmatpush3.msra.mxu0 %v228_v49  ;;  %1030 = vmatprep.mubr.msk.f32.mxu0 %vm1073_vm0, %v1072_v0 }
 0x224   : > { %v1061_v51 = vpop.eup %1060  ;;  %v576_v52 = vmul.f32 %v1059_v50, %v1051_v35 }
 0x225   : > { %v577_v54 = vmul.f32 %v1061_v51, %v1053_v36 }
 0x226   : > { %1026 = vmatmul.mubr.msk.f32.vlgmr.msra.gmra.mrb[4].mxu1 %vm230_vm1, %v576_v52 }
 0x227   : > { %v1063_v55 = vpop.eup %1062  ;;  %1031 = vmatmul.mubr.msk.f32.vlgmr.msra.gmra.mrb[6].mxu0 %vm230_vm1, %v577_v54  ;;  %1034 = vmatpush3.msra.mxu1 %v229_v53 }
 0x228   : > { %v578_v56 = vmul.f32 %v1063_v55, %v1055_v39  ;;  %1035 = vmatprep.mubr.msk.f32.mxu1 %vm1073_vm0, %v1072_v0 }
 0x22a   : > { %1036 = vmatmul.mubr.msk.f32.vlgmr.msra.gmra.mrb[6].mxu1 %vm230_vm1, %v578_v56 }
 0x2f5   : > { %v648_v57 = vpop.f32.mrb[4].mxu0 }
 0x2f6   : > { %871 = vst.msk [vmem:[%s216_s27] sm:$0xff] %vm230_vm1, %v648_v57  ;;  %v1022_v58 = vpop.f32.mrb[5].mxu0 }
 0x2f9   : > { %v721_v59 = vpop.f32.mrb[4].mxu1 }
 0x2fa   : > { %872 = vst.msk [vmem:[%s216_s27 + $0x8] sm:$0xff] %vm230_vm1, %v721_v59  ;;  %v794_v60 = vpop.f32.mrb[6].mxu0  ;;  %v1027_v61 = vpop.f32.mrb[5].mxu1 }
 0x2fb   : > { %873 = vst.msk [vmem:[%s216_s27 + $0x10] sm:$0xff] %vm230_vm1, %v794_v60  ;;  %v1032_v62 = vpop.f32.mrb[7].mxu0 }
 0x2fd   : > { %v867_v63 = vpop.f32.mrb[6].mxu1 }
 0x2fe   : > { %874 = vst.msk [vmem:[%s216_s27 + $0x18] sm:$0xff] %vm230_vm1, %v867_v63  ;;  %v1037_v0 = vpop.f32.mrb[7].mxu1 }
 0x2ff PF: > { %s13_s12 = sadd.s32 1, %s1070_s12  }
 0x300   : > { %p10_p4 = scmp.ge.s32.totalorder %s13_s12, 4  }
 0x302   :  { %12 = sbr.rel (!%p10_p4) target bundleno = 1 (0x1), region = 68 }

// kernel: unilm_moe_layer_forward.6
= control target key start
LH: loop header
LB: loop body
LE: loop exit
PB: predicated region body
PF: predicated region fallthrough
CT: control target
= control target key end

     0   :  { %vm29_vm0 = vcmask 261120   ;;  %v236_v3 = vmov 0.0   ;;  %s336_s2 = inlined_call_operand.vmem [shape: f32[32,32], index: 2, kind: input, shape index: {}]   ;;  %s337_s0 = inlined_call_operand.vmem [shape: f32[16,32], index: 0, kind: input, shape index: {}]   ;;  %s338_s3 = inlined_call_operand.vmem [shape: f32[1,32], index: 3, kind: input, shape index: {}]   ;;  %s339_s1 = inlined_call_operand.vmem [shape: f32[16,32], index: 1, kind: input, shape index: {}]   ;;  %s340_s6 = inlined_call_operand.vmem [shape: f32[16,32], index: 6, kind: output, shape index: {0}]   ;;  %s341_s4 = inlined_call_operand.vmem [shape: f32[1,32], index: 4, kind: input, shape index: {}]   ;;  %s342_s5 = inlined_call_operand.vmem [shape: f32[1,32], index: 5, kind: input, shape index: {}]   ;;  %s343_s7 = inlined_call_operand.vmem [shape: f32[16,32], index: 7, kind: output, shape index: {1}]  }
   0x1   :  { %v36_v0 = vld [vmem:[%s336_s2] sm:$0xff]  ;;  %v37_v1 = vld [vmem:[%s336_s2 + $0x8] sm:$0xff]  ;;  %v38_v2 = vld [vmem:[%s336_s2 + $0x10] sm:$0xff]  ;;  %31 = vst.msk [vmem:[#allocation2 + $0x8] sm:$0xff] %vm29_vm0, %v236_v3 }
   0x2   :  { %30 = vst.msk [vmem:[#allocation2] sm:$0xff] %vm29_vm0, %v236_v3  ;;  %v223_v4 = vpack.c.bf16 %v37_v1, %v36_v0  ;;  %v39_v5 = vld [vmem:[%s336_s2 + $0x18] sm:$0xff]  ;;  %v34_v6 = vld [vmem:[%s337_s0] sm:$0xff]  ;;  %v35_v8 = vld [vmem:[%s337_s0 + $0x8] sm:$0xff] }
   0x3   :  { %v227_v7 = vpack.c.bf16 %v39_v5, %v38_v2  ;;  %220 = vmatprep.mubr.msk.f32.mxu0 %vm29_vm0, %v34_v6  ;;  %v203_v15 = vld [vmem:[%s338_s3] ss:$0 sm:$0xff]  ;;  %v141_v17 = vld [vmem:[%s339_s1 + $0x8] sm:$0xff] }
   0x4   :  { %224 = vmatprep.subr.bf16.mxu0 %v223_v4  ;;  %v140_v19 = vld [vmem:[%s339_s1] sm:$0xff] }
   0x5   :  { %226 = vmatpush3.bf16.msra.mxu0 %v223_v4  ;;  %v204_v43 = vld [vmem:[%s341_s4] ss:$0 sm:$0xff] }
   0x6   :  { %228 = vmatprep.subr.bf16.mxu0 %v227_v7  ;;  %v205_v45 = vld [vmem:[%s342_s5] ss:$0 sm:$0xff] }
   0x8   :  { %v33_v9 = vld [vmem:[#allocation2 + $0x8] sm:$0xff] }
   0x9   :  { %230 = vmatpush3.bf16.msra.mxu0 %v227_v7  ;;  %v32_v10 = vld [vmem:[#allocation2] sm:$0xff] }
   0xc   :  { %221 = vmatmul.mubr.msk.f32.vlgmr.msra.gmra.mrb[0].mxu0 %vm29_vm0, %v35_v8 }
  0xdf   :  { %v222_v11 = vpop.f32.mrb[0].mxu0 }
  0xe0   :  { %v123_v12 = vadd.f32 %v222_v11, %v33_v9  ;;  %v113_v13 = vpop.f32.mrb[1].mxu0 }
  0xe1   :  { %v122_v14 = vadd.f32 %v113_v13, %v32_v10 }
  0xe2   :  { %125 = vst.msk [vmem:[#allocation2 + $0x8] sm:$0xff] %vm29_vm0, %v123_v12 }
  0xe3   :  { %124 = vst.msk [vmem:[#allocation2] sm:$0xff] %vm29_vm0, %v122_v14 }
  0xe9   :  { %v130_v16 = vld [vmem:[#allocation2 + $0x8] sm:$0xff] }
  0xea   :  { %v129_v18 = vld [vmem:[#allocation2] sm:$0xff]  ;;  %v139_v20 = vadd.f32 %v203_v15, %v130_v16 }
  0xeb   :  { %v138_v21 = vadd.f32 %v203_v15, %v129_v18 }
  0xec   :  { %v143_v22 = vadd.f32 %v141_v17, %v139_v20 }
  0xed   :  { %v142_v23 = vadd.f32 %v140_v19, %v138_v21 }
  0xee   :  { %145 = vst.msk [vmem:[%s340_s6 + $0x8] sm:$0xff] %vm29_vm0, %v143_v22  ;;  %v149_v25 = vsel %vm29_vm0, %v143_v22, 0.0 }
  0xef   :  { %v146_v24 = vsel %vm29_vm0, %v142_v23, 0.0  ;;  %144 = vst.msk [vmem:[%s340_s6] sm:$0xff] %vm29_vm0, %v142_v23 }
  0xf0   :  { %147 = vadd.xlane.f32.xlu0 %v146_v24 }
  0xf4   :  { %150 = vadd.xlane.f32.xlu0 %v149_v25 }
 0x17d   :  { %v148_v26 = vpop.xlane.xlu0 %147 }
 0x17e   :  { %v153_v27 = vmul.f32 0.03125, %v148_v26 }
 0x180   :  { %v155_v28 = vsub.f32 %v142_v23, %v153_v27 }
 0x181   :  { %v151_v29 = vpop.xlane.xlu0 %150 }
 0x182   :  { %v154_v30 = vmul.f32 0.03125, %v151_v29  ;;  %v157_v31 = vmul.f32 %v155_v28, %v155_v28 }
 0x184   :  { %v156_v32 = vsub.f32 %v143_v22, %v154_v30  ;;  %v159_v33 = vsel %vm29_vm0, %v157_v31, 0.0 }
 0x185   :  { %160 = vadd.xlane.f32.xlu1 %v159_v33 }
 0x186   :  { %v158_v34 = vmul.f32 %v156_v32, %v156_v32 }
 0x188   :  { %v162_v35 = vsel %vm29_vm0, %v158_v34, 0.0 }
 0x189   :  { %163 = vadd.xlane.f32.xlu1 %v162_v35 }
 0x212   :  { %v161_v36 = vpop.xlane.xlu1 %160 }
 0x213   :  { %v165_v37 = vmul.f32 0.03125, %v161_v36 }
 0x215   :  { %v167_v38 = vadd.f32 1e-05, %v165_v37 }
 0x216   :  { %v164_v39 = vpop.xlane.xlu1 %163 }
 0x217   :  { %232 = vrsqrt.f32 %v167_v38  ;;  %v166_v40 = vmul.f32 0.03125, %v164_v39 }
 0x219   :  { %v168_v41 = vadd.f32 1e-05, %v166_v40 }
 0x21b   :  { %234 = vrsqrt.f32 %v168_v41 }
 0x221   :  { %v233_v42 = vpop.eup %232 }
 0x222   :  { %v171_v44 = vmul.f32 %v233_v42, %v155_v28 }
 0x224   :  { %v180_v46 = vmul.f32 %v204_v43, %v171_v44 }
 0x225   :  { %v235_v47 = vpop.eup %234 }
 0x226   :  { %v189_v48 = vadd.f32 %v205_v45, %v180_v46  ;;  %v172_v49 = vmul.f32 %v235_v47, %v156_v32 }
 0x228   :  { %191 = vst.msk [vmem:[%s343_s7] sm:$0xff] %vm29_vm0, %v189_v48  ;;  %v181_v50 = vmul.f32 %v204_v43, %v172_v49 }
 0x22a   :  { %v190_v51 = vadd.f32 %v205_v45, %v181_v50 }
 0x22c   :  { %192 = vst.msk [vmem:[%s343_s7 + $0x8] sm:$0xff] %vm29_vm0, %v190_v51 }

// kernel: unilm_moe_layer_forward.7
= control target key start
LH: loop header
LB: loop body
LE: loop exit
PB: predicated region body
PF: predicated region fallthrough
CT: control target
= control target key end

     0   :  { %12 = vsyncpa [#allocation6], 0  ;;  %s1158_s24 = smov 0   ;;  %s1160_s25 = smov 0   ;;  %s1313_s0 = inlined_call_operand.vmem [shape: f32[16,32], index: 0, kind: input, shape index: {}]   ;;  %s1314_s1 = inlined_call_operand.vmem [shape: f32[16,32], index: 1, kind: input, shape index: {}]   ;;  %s1315_s2 = inlined_call_operand.vmem [shape: f32[32,4], index: 2, kind: input, shape index: {}]   ;;  %s1316_s3 = inlined_call_operand.vmem [shape: f32[4,32,64], index: 3, kind: input, shape index: {}]   ;;  %s1317_s4 = inlined_call_operand.vmem [shape: f32[4,1,64], index: 4, kind: input, shape index: {}]   ;;  %s1318_s5 = inlined_call_operand.vmem [shape: f32[4,64,32], index: 5, kind: input, shape index: {}]   ;;  %s1319_s6 = inlined_call_operand.vmem [shape: f32[4,1,32], index: 6, kind: input, shape index: {}]   ;;  %s1320_s7 = inlined_call_operand.hbm [shape: f32[16,32], index: 7, kind: output, shape index: {}]  }
   0x1   :  { %s1162_s26 = smov 0  }
   0x2 LB: > { %s894_s27 = sadd.s32 4294967295, %s1111_s26   ;;  %s27_s28 = sadd.s32 1, %s1107_s25  ;;  %s1111_s26 = sphi %s1162_s26, %s18_s26   ;;  %s1107_s25 = sphi %s1160_s25, %s1323_s25   ;;  %s1103_s24 = sphi %s1158_s24, %s1322_s24  }
   0x3   : > { %p28_p0 = scmp.ge.s32.totalorder %s27_s28, 4  ;;  %p899_p1 = scmp.ge.s32.totalorder %s1111_s26, 1 }
   0x4   : > { %p298_p2 = scmp.lt.s32.totalorder %s1111_s26, 5 }
   0x5   : > { %s1325_s28 = smov (%p28_p0, %s27_s28), 0 }
   0x6   : > { %p299_p3 = pnand %p899_p1, %p298_p2 }
   0x7   : > { %p358_p4 = scmp.lt.s32.totalorder (!%p299_p3), %s1103_s24, 3  ;;  %p904_p5 = scmp.ne.s32.totalorder (!%p299_p3), %s1103_s24, 0 }
   0x8   : > { %302 = sbr.rel (%p299_p3) target bundleno = 1484 (0x5cc), region = 48 }
   0xf   : > { %s1181_s29 = scalar_select %p358_p4, %s1103_s24, 3 }
  0x10   : > { %378 = sbr.rel (%p904_p5) target bundleno = 999 (0x3e7), region = 52  ;;  %v384_v0 = vld [vmem:[%s1315_s2] sm:$0xff] (!%p904_p5)  ;;  %v385_v1 = vld [vmem:[%s1315_s2 + $0x8] sm:$0xff] (!%p904_p5)  ;;  %v386_v2 = vld [vmem:[%s1315_s2 + $0x10] sm:$0xff] (!%p904_p5)  ;;  %vm379_vm0 = vcmask (!%p904_p5), 261120   ;;  %v1113_v5 = vmov (!%p904_p5), 0.0   ;;  %v498_v31 = vlaneseq (!%p904_p5) }
  0x11   : > { %s918_s30 = sshll.u32 %s1181_s29, 5  ;;  %s365_s10 = scalar_lea.vmem %s1317_s4, %s1181_s29  ;;  %v983_v3 = vpack.c.bf16 (!%p904_p5), %v385_v1, %v384_v0  ;;  %v387_v4 = vld [vmem:[%s1315_s2 + $0x18] sm:$0xff] (!%p904_p5)  ;;  %380 = vst.msk [vmem:[#allocation2] sm:$0xff] (!%p904_p5), %vm379_vm0, %v1113_v5  ;;  %381 = vst.msk [vmem:[#allocation2 + $0x8] sm:$0xff] (!%p904_p5), %vm379_vm0, %v1113_v5  ;;  %v382_v6 = vld [vmem:[%s1313_s0] sm:$0xff] (!%p904_p5)  ;;  %vm469_vm1 = vcmask (!%p904_p5), 31744  }
  0x12   : > { %s1191_s13 = scalar_lea.vmem %s1316_s3, %s918_s30  ;;  %s919_s14 = sshll.u32 %s1181_s29, 6  ;;  %v987_v7 = vpack.c.bf16 (!%p904_p5), %v387_v4, %v386_v2  ;;  %950 = vmatprep.mubr.msk.f32.mxu0 (!%p904_p5), %vm379_vm0, %v382_v6  ;;  %v383_v8 = vld [vmem:[%s1313_s0 + $0x8] sm:$0xff] (!%p904_p5)  ;;  %v499_v32 = vand.u32 (!%p904_p5), 127, %v498_v31  ;;  %vm534_vm2 = vcmask (!%p904_p5), 7168  }
  0x13   : > { %s1197_s17 = scalar_lea.vmem %s1318_s5, %s919_s14  ;;  %s373_s20 = scalar_lea.vmem %s1319_s6, %s1181_s29  ;;  %984 = vmatprep.subr.bf16.mxu0 (!%p904_p5), %v983_v3 }
  0x14   : > { %986 = vmatpush3.bf16.msra.mxu0 (!%p904_p5), %v983_v3 }
  0x15   : > { %988 = vmatprep.subr.bf16.mxu0 (!%p904_p5), %v987_v7 }
  0x18   : > { %990 = vmatpush3.bf16.msra.mxu0 %v987_v7 }
  0x1b   : > { %951 = vmatmul.mubr.msk.f32.vlgmr.msra.gmra.mrb[0].mxu0 %vm379_vm0, %v383_v8 }
  0xee   : > { %v952_v9 = vpop.f32.mrb[0].mxu0 }
  0xef   : > { %v460_v10 = vpop.f32.mrb[1].mxu0  ;;  %v473_v12 = vsel %vm469_vm1, %v952_v9, -inf }
  0xf0   : > { %v470_v11 = vsel %vm469_vm1, %v460_v10, -inf }
  0xf1   : > { %471 = vmax.xlane.f32.xlu0 %v470_v11 }
  0xf5   : > { %474 = vmax.xlane.f32.xlu0 %v473_v12 }
 0x17e   : > { %v472_v13 = vpop.xlane.xlu0 %471 }
 0x17f   : > { %v476_v14 = vsub.f32 %v460_v10, %v472_v13 }
 0x181   : > { %v478_v15 = vmul.f32 1.442695, %v476_v14 }
 0x182   : > { %v475_v16 = vpop.xlane.xlu0 %474 }
 0x183   : > { %1050 = vpow2.f32 %v478_v15  ;;  %v477_v17 = vsub.f32 %v952_v9, %v475_v16 }
 0x185   : > { %v480_v18 = vmul.f32 1.442695, %v477_v17 }
 0x187   : > { %1052 = vpow2.f32 %v480_v18 }
 0x18d   : > { %v1051_v19 = vpop.eup %1050 }
 0x18e   : > { %v482_v20 = vsel %vm469_vm1, %v1051_v19, 0.0 }
 0x18f   : > { %483 = vadd.xlane.f32.xlu1 %v482_v20 }
 0x191   : > { %v1053_v21 = vpop.eup %1052 }
 0x192   : > { %v485_v22 = vsel %vm469_vm1, %v1053_v21, 0.0 }
 0x193   : > { %486 = vadd.xlane.f32.xlu1 %v485_v22 }
 0x21c   : > { %v484_v23 = vpop.xlane.xlu1 %483 }
 0x21d   : > { %1054 = vrcp.f32 %v484_v23 }
 0x220   : > { %v487_v24 = vpop.xlane.xlu1 %486 }
 0x221   : > { %1056 = vrcp.f32 %v487_v24 }
 0x227   : > { %v1055_v25 = vpop.eup %1054 }
 0x228   : > { %v489_v26 = vmul.f32 %v1055_v25, %v1051_v19 }
 0x22a   : > { %v492_v27 = vsel %vm469_vm1, %v489_v26, -inf }
 0x22b   : > { %v1057_v28 = vpop.eup %1056  ;;  %493 = vmax.xlane.f32.xlu0 %v492_v27 }
 0x22c   : > { %v491_v29 = vmul.f32 %v1057_v28, %v1053_v21 }
 0x22e   : > { %v495_v30 = vsel %vm469_vm1, %v491_v29, -inf }
 0x22f   : > { %496 = vmax.xlane.f32.xlu1 %v495_v30 }
 0x2b8   : > { %v494_v33 = vpop.xlane.xlu0 %493 }
 0x2b9   : > { %vm500_vm3 = vcmp.ge.f32.partialorder %v489_v26, %v494_v33  ;;  %535 = vst.msk [vmem:[#allocation3] sm:$0xff] %vm534_vm2, %v494_v33 }
 0x2ba   : > { %v502_v34 = vsel %vm500_vm3, %v499_v32, 4 }
 0x2bb   : > { %v504_v35 = vsel %vm469_vm1, %v502_v34, 2147483647 }
 0x2bc   : > { %v497_v36 = vpop.xlane.xlu1 %496  ;;  %v506_v37 = vshra.s32 %v504_v35, 16  ;;  %v505_v43 = vand.u32 65535, %v504_v35 }
 0x2bd   : > { %vm501_vm4 = vcmp.ge.f32.partialorder %v491_v29, %v497_v36  ;;  %536 = vst.msk [vmem:[#allocation3 + $0x8] sm:$0xff] %vm534_vm2, %v497_v36 }
 0x2be   : > { %v503_v38 = vsel %vm501_vm4, %v499_v32, 4  ;;  %v508_v39 = vcvt.s32.f32 %v506_v37  ;;  %v507_v45 = vcvt.s32.f32 %v505_v43 }
 0x2bf   : > { %v519_v40 = vsel %vm469_vm1, %v503_v38, 2147483647 }
 0x2c0   : > { %509 = vmin.xlane.f32.xlu0 %v508_v39  ;;  %v521_v41 = vshra.s32 %v519_v40, 16  ;;  %v520_v46 = vand.u32 65535, %v519_v40 }
 0x2c2   : > { %v523_v42 = vcvt.s32.f32 %v521_v41  ;;  %v522_v49 = vcvt.s32.f32 %v520_v46 }
 0x2c4   : > { %524 = vmin.xlane.f32.xlu1 %v523_v42 }
 0x34d   : > { %v510_v44 = vpop.xlane.xlu0 %509 }
 0x34e   : > { %vm511_vm5 = vcmp.eq.f32.partialorder %v508_v39, %v510_v44  ;;  %v516_v51 = vcvt.f32.s32 %v510_v44 }
 0x34f   : > { %v512_v47 = vsel %vm511_vm5, %v507_v45, inf }
 0x350   : > { %513 = vmin.xlane.f32.xlu0 %v512_v47  ;;  %v517_v53 = vshll.u32 %v516_v51, 16 }
 0x351   : > { %v525_v48 = vpop.xlane.xlu1 %524 }
 0x352   : > { %vm526_vm6 = vcmp.eq.f32.partialorder %v523_v42, %v525_v48  ;;  %v531_v54 = vcvt.f32.s32 %v525_v48 }
 0x353   : > { %v527_v50 = vsel %vm526_vm6, %v522_v49, inf }
 0x354   : > { %528 = vmin.xlane.f32.xlu1 %v527_v50  ;;  %v532_v58 = vshll.u32 %v531_v54, 16 }
 0x3dd   : > { %v514_v52 = vpop.xlane.xlu0 %513 }
 0x3de   : > { %v515_v55 = vcvt.f32.s32 %v514_v52 }
 0x3e0   : > { %v518_v56 = vadd.s32 %v517_v53, %v515_v55 }
 0x3e1   : > { %v529_v57 = vpop.xlane.xlu1 %528 }
 0x3e2   : > { %537 = vst.msk [vmem:[#allocation4] sm:$0xff] %vm534_vm2, %v518_v56  ;;  %v530_v59 = vcvt.f32.s32 %v529_v57 }
 0x3e4   : > { %v533_v60 = vadd.s32 %v532_v58, %v530_v59 }
 0x3e6   : > { %538 = vst.msk [vmem:[#allocation4 + $0x8] sm:$0xff] %vm534_vm2, %v533_v60 }
 0x3e7 PF: > { %v550_v61 = vld [vmem:[%s1191_s13] sm:$0xff]  ;;  %v551_v62 = vld [vmem:[%s1191_s13 + $0x8] sm:$0xff]  ;;  %v552_v63 = vld [vmem:[%s1191_s13 + $0x10] sm:$0xff]  ;;  %vm561_vm7 = vcmask 261120   ;;  %v541_v18 = vstv %s1103_s24  ;;  %v1114_v21 = vmov 0   ;;  %vm660_vm10 = vcmask 523264  }
 0x3e8   : > { %v991_v0 = vpack.c.bf16 %v551_v62, %v550_v61  ;;  %v553_v1 = vld [vmem:[%s1191_s13 + $0x18] sm:$0xff]  ;;  %v548_v2 = vld [vmem:[%s1313_s0] sm:$0xff]  ;;  %v646_v5 = vld [vmem:[%s1197_s17 + $0x8] sm:$0xff]  ;;  %1058 = vset.pattern.permute.xlu0 %v1114_v21  ;;  %p913_p6 = scmp.ne.s32.totalorder %s1103_s24, 3 }
 0x3e9   : > { %v995_v3 = vpack.c.bf16 %v553_v1, %v552_v63  ;;  %961 = vmatprep.mubr.msk.f32.mxu0 %vm561_vm7, %v548_v2  ;;  %v645_v4 = vld [vmem:[%s1197_s17] sm:$0xff]  ;;  %v647_v6 = vld [vmem:[%s1197_s17 + $0x10] sm:$0xff]  ;;  %v648_v8 = vld [vmem:[%s1197_s17 + $0x18] sm:$0xff] }
 0x3ea   : > { %992 = vmatprep.subr.bf16.mxu0 %v991_v0  ;;  %v999_v7 = vpack.c.bf16 %v646_v5, %v645_v4  ;;  %v1003_v9 = vpack.c.bf16 %v648_v8, %v647_v6  ;;  %v649_v10 = vld [vmem:[%s1197_s17 + $0x20] sm:$0xff]  ;;  %v650_v11 = vld [vmem:[%s1197_s17 + $0x28] sm:$0xff]  ;;  %v651_v14 = vld [vmem:[%s1197_s17 + $0x30] sm:$0xff] }
 0x3eb   : > { %994 = vmatpush3.bf16.msra.mxu0 %v991_v0  ;;  %v1007_v12 = vpack.c.bf16 %v650_v11, %v649_v10  ;;  %v549_v13 = vld [vmem:[%s1313_s0 + $0x8] sm:$0xff]  ;;  %v652_v15 = vld [vmem:[%s1197_s17 + $0x38] sm:$0xff]  ;;  %v539_v17 = vld [vmem:[#allocation4] sm:$0xff] }
 0x3ec   : > { %996 = vmatprep.subr.bf16.mxu0 %v995_v3  ;;  %1000 = vmatprep.subr.bf16.mxu1 %v999_v7  ;;  %v1011_v16 = vpack.c.bf16 %v652_v15, %v651_v14  ;;  %v544_v19 = vld [vmem:[#allocation3] sm:$0xff]  ;;  %vm542_vm8 = vcmp.eq.s32.totalorder %v539_v17, %v541_v18  ;;  %v545_v22 = vld [vmem:[#allocation3 + $0x8] sm:$0xff]  ;;  %v907_v25 = vld [vmem:[%s365_s10] ss:$0 sm:$0xff] }
 0x3ed   : > { %1002 = vmatpush3.bf16.msra.mxu1 %v999_v7  ;;  %v540_v20 = vld [vmem:[#allocation4 + $0x8] sm:$0xff]  ;;  %v546_v23 = vsel %vm542_vm8, %v544_v19, 0.0  ;;  %v910_v33 = vld [vmem:[%s373_s20] ss:$0 sm:$0xff] }
 0x3ee   : > { %1004 = vmatprep.subr.bf16.mxu1 %v1003_v9  ;;  %vm543_vm9 = vcmp.eq.s32.totalorder %v540_v20, %v541_v18  ;;  %746 = vperm.xlu0 %1058, %v546_v23   ;;  %v743_v38 = vld [vmem:[#allocation2 + $0x8] sm:$0xff]  ;;  %v742_v41 = vld [vmem:[#allocation2] sm:$0xff] }
 0x3ef   : > { %998 = vmatpush3.bf16.msra.mxu0 %v995_v3  ;;  %v547_v24 = vsel %vm543_vm9, %v545_v22, 0.0  ;;  %v764_v45 = vld [vmem:[%s1314_s1] sm:$0xff] (!%p913_p6)  ;;  %v765_v47 = vld [vmem:[%s1314_s1 + $0x8] sm:$0xff] (!%p913_p6) }
 0x3f1   : > { %1006 = vmatpush3.bf16.msra.mxu1 %v1003_v9 }
 0x3f2   : > { %962 = vmatmul.mubr.msk.f32.vlgmr.msra.gmra.mrb[0].mxu0 %vm561_vm7, %v549_v13  ;;  %1008 = vmatprep.subr.bf16.mxu1 %v1007_v12 }
 0x3f3   : > { %751 = vperm.xlu0 %1058, %v547_v24  }
 0x3f5   : > { %1010 = vmatpush3.bf16.msra.mxu1 %v1007_v12 }
 0x3f6   : > { %1012 = vmatprep.subr.bf16.mxu1 %v1011_v16 }
 0x3f9   : > { %1014 = vmatpush3.bf16.msra.mxu1 %v1011_v16 }
 0x46d   : > { %v747_v32 = vpop.permute.xlu0 %746 }
 0x472   : > { %v752_v37 = vpop.permute.xlu0 %751 }
 0x4c5   : > { %v963_v26 = vpop.f32.mrb[0].mxu0 }
 0x4c6   : > { %v640_v27 = vadd.f32 %v963_v26, %v907_v25  ;;  %v634_v28 = vpop.f32.mrb[1].mxu0 }
 0x4c7   : > { %v635_v29 = vadd.f32 %v907_v25, %v634_v28 }
 0x4c8   : > { %v644_v31 = vmax.f32 %v640_v27, 0.0 }
 0x4c9   : > { %v643_v30 = vmax.f32 %v635_v29, 0.0 }
 0x4cb   : > { %980 = vmatprep.mubr.msk.f32.mxu1 %vm660_vm10, %v643_v30 }
 0x4cc   : > { %981 = vmatmul.mubr.msk.f32.vlgmr.msra.gmra.mrb[0].mxu1 %vm660_vm10, %v644_v31 }
 0x59f   : > { %v982_v34 = vpop.f32.mrb[0].mxu1 }
 0x5a0   : > { %v739_v35 = vadd.f32 %v982_v34, %v910_v33  ;;  %v733_v36 = vpop.f32.mrb[1].mxu1 }
 0x5a1   : > { %v734_v39 = vadd.f32 %v910_v33, %v733_v36  ;;  %763 = sbr.rel (%p913_p6) target bundleno = 1458 (0x5b2), region = 56 }
 0x5a2   : > { %v755_v40 = vmul.f32 %v752_v37, %v739_v35 }
 0x5a3   : > { %v754_v42 = vmul.f32 %v747_v32, %v734_v39 }
 0x5a4   : > { %v757_v43 = vadd.f32 %v755_v40, %v743_v38 }
 0x5a5   : > { %v756_v44 = vadd.f32 %v754_v42, %v742_v41 }
 0x5a6   : > { %759 = vst.msk [vmem:[#allocation2 + $0x8] sm:$0xff] %vm561_vm7, %v757_v43 }
 0x5a7   : > { %758 = vst.msk [vmem:[#allocation2] sm:$0xff] %vm561_vm7, %v756_v44 }
 0x5ad   : > { %v767_v49 = vld [vmem:[#allocation2 + $0x8] sm:$0xff] }
 0x5ae   : > { %v766_v46 = vld [vmem:[#allocation2] sm:$0xff]  ;;  %v769_v50 = vadd.f32 %v767_v49, %v765_v47 }
 0x5af   : > { %v768_v48 = vadd.f32 %v766_v46, %v764_v45 }
 0x5b0   : > { %771 = vst.msk [vmem:[#allocation5 + $0x8] sm:$0xff] %vm561_vm7, %v769_v50 }
 0x5b1   : > { %770 = vst.msk [vmem:[#allocation5] sm:$0xff] %vm561_vm7, %v768_v48 }
 0x5b2 PF: > { %p1278_p7 = scmp.eq.s32.totalorder %s894_s27, 3  ;;  %s1115_s11 = smov [#allocation5]  }
 0x5b3   : > { %s781_s12 = sshll.u32 %s1115_s11, 4  ;;  %s782_s12 = int_to_ptr.vmem [resolvable:$true] %s781_s12 }
 0x5b4   : > { %s1059_s14 = scalar_lea.vmem %s782_s12, 256  ;;  %p1066_p11 = scmp.lt.s32.totalorder %s782_s12, %s782_s12 }
 0x5b5   : > { %p1060_p8 = scmp.ne.s32.totalorder %s782_s12, %s1059_s14  ;;  %p1067_p12 = scmp.lt.s32.totalorder %s1059_s14, %s1059_s14 }
 0x5b7   : > { %p1061_p9 = pnand %p1060_p8, %p1278_p7  ;;  %p1068_p13 = por %p1067_p12, %p1066_p11 }
 0x5b9   : > { %p1062_p10 = pneg %p1061_p9 }
 0x5bb   : > { %p1069_p0 = pnand %p1068_p13, %p1062_p10 }
 0x5bd   : > { %1072 = shalt.err (!%p1069_p0)
}
 0x5be   : > { %s1073_s27 = scalar_lea.hbm %s1320_s7, 256 }
 0x5bf   : > { %p1074_p1 = scmp.ne.s32.totalorder %s1320_s7, %s1073_s27  ;;  %p1079_p4 = scmp.lt.u32.totalorder %s1073_s27, %s1320_s7 }
 0x5c1   : > { %p1075_p2 = pnand %p1074_p1, %p1278_p7 }
 0x5c3   : > { %p1076_p3 = pneg %p1075_p2 }
 0x5c5   : > { %p1081_p5 = pnand %p1079_p4, %p1076_p3 }
 0x5c7   : > { %1084 = shalt.err (!%p1081_p5)
}
 0x5c8   : > { %s1116_s22 = smov 128   ;;  %s1117_s23 = smov 8  }
 0x5c9   : > { %1016 = dma.vmem_to_hbm [thread:$0]  (%p1278_p7), %s782_s12, 256, %s1320_s7, [#allocation6], %s1116_s22, %s1116_s22, %s1117_s23  }
 0x5ca   : > { %1098 = dma.done.wait (%p1278_p7), [#allocation6], 256  }
 0x5cb   : > { %1100 = vsyncadd (%p1278_p7), [#allocation6], 4294967040 }
 0x5cc PF: > { %s18_s26 = sadd.s32 1, %s1111_s26   ;;  %s1322_s24 = smov %s1107_s25 }
 0x5cd   : > { %p15_p6 = scmp.ge.s32.totalorder %s18_s26, 6   ;;  %s1323_s25 = smov %s1325_s28 }
 0x5cf   :  { %17 = sbr.rel (!%p15_p6) target bundleno = 2 (0x2), region = 99 }
 0x5d6   :  { %797 = vsyncpa [#allocation6], 1 }
 0x5d7   :  { %799 = vsyncpa [#allocation6 + $0x1], 1 }

</bundles_post_ra>
